<compile_context>
chip_gen: v7x
topology: tpu7x:2x2x1
jax: 0.10.0
libtpu: 0.0.40
codegen_flags: <defaults>
</compile_context>

<pallas_src>
import jax
import jax.numpy as jnp
from jax.experimental import pallas as pl
from jax.experimental.pallas import tpu as pltpu

# ----------------------- synthetic "setting_dict" -----------------------
NUM_CLASSES = 6
ANCHORS = 4            # anchors per spatial location
ROW_PAD = 8            # anchor groups padded to one (8-row) sublane tile
CENTER_VAR = 0.1
SIZE_VAR = 0.2

R_CLS = NUM_CLASSES * ROW_PAD     # 48 cls rows  (c*8 + a, a<ANCHORS valid)
R_REG = 4 * ROW_PAD               # 32 reg rows  (coord*8 + a)
R_ALL = R_CLS + R_REG             # 80 fused conv-output rows
LANE = 128
X_OFF = 128                       # start of the padded image inside the flat buffer


# ------------------------------ Pallas kernel ------------------------------
def _make_kernel(W, p_len, x_off):
    Wp = W + 2

    def kernel(x_ref, w_ref, b_ref, pr_ref, scores_ref, boxes_ref):
        # x_ref : (C, L)       flat zero-padded image; lanes = padded flat position
        # w_ref : (9, 80, C)   per-tap fused cls||reg weights (rows c*8+a, then coord*8+a)
        # b_ref : (80, 1)      fused bias (dead cls rows = -1e30 so they vanish in softmax)
        # pr_ref: (32, p_len)  priors, rows = coord*8 + a (cx, cy, w, h)
        # scores_ref : (48, p_len)   softmax scores (rows c*8+a; a<4 valid)
        # boxes_ref  : (32, p_len)   corner boxes   (rows k*8+a;  a<4 valid)

        # ---- 3x3 conv = 9 shifted MXU dots, f32 accumulation (in-kernel im2col) ----
        acc = None
        for t in range(9):
            dy, dx = divmod(t, 3)
            start = x_off + (dy - 1) * Wp + (dx - 1)          # static lane offset
            xs = x_ref[:, start:start + p_len]                # (C, p_len)
            d = jnp.dot(w_ref[t], xs, preferred_element_type=jnp.float32)
            acc = d if acc is None else acc + d
        out = acc + b_ref[...]                                # (80, p_len)

        # ---- softmax over classes: 6 sublane-aligned (8, M) groups, one EUP exp ----
        cls = out[0:R_CLS, :]
        m = cls[0:ROW_PAD, :]
        for c in range(1, NUM_CLASSES):
            m = jnp.maximum(m, cls[c * ROW_PAD:(c + 1) * ROW_PAD, :])
        num = jnp.exp(jnp.concatenate(
            [cls[c * ROW_PAD:(c + 1) * ROW_PAD, :] - m for c in range(NUM_CLASSES)],
            axis=0))                                          # (48, M)
        den = num[0:ROW_PAD, :]
        for c in range(1, NUM_CLASSES):
            den = den + num[c * ROW_PAD:(c + 1) * ROW_PAD, :]
        inv = pl.reciprocal(den, approx=True)                 # EUP vrcp
        inv = inv * (2.0 - den * inv)                         # one Newton step (~1e-7 rel)
        scores_ref[...] = num * jnp.concatenate([inv] * NUM_CLASSES, axis=0)

        # ---- location2box + center2corner on aligned (8/16, M) groups ----
        loc = out[R_CLS:R_ALL, :]                             # (32, M) rows = coord*8 + a
        pr = pr_ref[...]
        ctr = loc[0:16, :] * CENTER_VAR * pr[16:32, :] + pr[0:16, :]   # cx rows 0:8, cy 8:16
        wh = jnp.exp(loc[16:32, :] * SIZE_VAR) * pr[16:32, :]          # w rows 0:8, h 8:16
        boxes_ref[...] = jnp.concatenate([ctr - 0.5 * wh, ctr + 0.5 * wh], axis=0)

    return kernel


# ------------------------------- wrapper -------------------------------
def box_head_forward(x_nhwc, params, priors):
    """Eval-mode forward: fused 3x3 conv heads -> softmax scores + decoded corner boxes."""
    N, H, W, C = x_nhwc.shape
    A, NC = ANCHORS, NUM_CLASSES
    Hp, Wp = H + 2, W + 2
    Mp = Hp * Wp                                  # padded positions per image
    p_len = pl.cdiv(Mp, LANE) * LANE              # lane-dense compute width (mult of 128)
    assert X_OFF >= Wp + 1, "X_OFF must cover the largest negative conv-tap offset"
    L = X_OFF + p_len + LANE                      # per-image flat buffer length

    # ---- flat zero-padded per-image feature buffer: (N, C, L) ----
    xp = jnp.pad(x_nhwc, ((0, 0), (1, 1), (1, 1), (0, 0)))                # (N, Hp, Wp, C)
    x_flat = jnp.transpose(xp, (0, 3, 1, 2)).reshape(N, C, Mp)
    x_flat = jnp.pad(x_flat, ((0, 0), (0, 0), (X_OFF, L - X_OFF - Mp)))   # (N, C, L)

    # ---- fused + permuted + sublane-padded weights / bias ----
    # conv channel layout: cls ch = a*NC + c, reg ch = a*4 + k  (PyTorch reshape order)
    wc = params["w_cls"].reshape(3, 3, C, A, NC).transpose(0, 1, 4, 3, 2)  # (3,3,NC,A,C)
    wc = jnp.pad(wc, ((0, 0), (0, 0), (0, 0), (0, ROW_PAD - A), (0, 0)))
    wc = wc.reshape(3, 3, R_CLS, C)
    wr = params["w_reg"].reshape(3, 3, C, A, 4).transpose(0, 1, 4, 3, 2)   # (3,3,4,A,C)
    wr = jnp.pad(wr, ((0, 0), (0, 0), (0, 0), (0, ROW_PAD - A), (0, 0)))
    wr = wr.reshape(3, 3, R_REG, C)
    w_all = jnp.concatenate([wc, wr], axis=2).reshape(9, R_ALL, C)         # (9, 80, C)

    bc = params["b_cls"].reshape(A, NC).T                                  # (NC, A)
    bc = jnp.pad(bc, ((0, 0), (0, ROW_PAD - A)), constant_values=-1e30)    # dead cls rows
    br = params["b_reg"].reshape(A, 4).T                                   # (4, A)
    br = jnp.pad(br, ((0, 0), (0, ROW_PAD - A)))
    bias = jnp.concatenate([bc.reshape(R_CLS), br.reshape(R_REG)]).reshape(R_ALL, 1)

    # ---- priors per padded position, shared across batch (NOT replicated): (32, p_len) ----
    pr = priors.reshape(H, W, A, 4).transpose(3, 2, 0, 1)                  # (4, A, H, W)
    pr = jnp.pad(pr, ((0, 0), (0, ROW_PAD - A), (1, 1), (1, 1)), constant_values=1.0)
    pr = pr.reshape(R_REG, Mp)
    pr = jnp.pad(pr, ((0, 0), (0, p_len - Mp)), constant_values=1.0)

    kernel = _make_kernel(W, p_len, X_OFF)
    scores_k, boxes_k = pl.pallas_call(
        kernel,
        out_shape=(jax.ShapeDtypeStruct((N, R_CLS, p_len), jnp.float32),
                   jax.ShapeDtypeStruct((N, R_REG, p_len), jnp.float32)),
        grid_spec=pltpu.PrefetchScalarGridSpec(
            num_scalar_prefetch=0,
            grid=(N,),
            in_specs=[
                pl.BlockSpec((None, C, L), lambda n: (n, 0, 0)),       # streamed per image
                pl.BlockSpec((9, R_ALL, C), lambda n: (0, 0, 0)),      # VMEM-resident
                pl.BlockSpec((R_ALL, 1), lambda n: (0, 0)),            # VMEM-resident
                pl.BlockSpec((R_REG, p_len), lambda n: (0, 0)),        # VMEM-resident
            ],
            out_specs=[
                pl.BlockSpec((None, R_CLS, p_len), lambda n: (n, 0, 0)),
                pl.BlockSpec((None, R_REG, p_len), lambda n: (n, 0, 0)),
            ],
        ),
        compiler_params=pltpu.CompilerParams(
            dimension_semantics=("parallel",),
            vmem_limit_bytes=32 * 1024 * 1024,
        ),
    )(x_flat, w_all, bias, pr)

    # ---- strip padding / un-permute to the reference (N, P, C) / (N, P, 4) layouts ----
    def _unpad(y, ch):
        y = y[:, :, :Mp].reshape(N, ch, ROW_PAD, Hp, Wp)[:, :, :A, 1:H + 1, 1:W + 1]
        return y.transpose(0, 3, 4, 2, 1).reshape(N, H * W * A, ch)

    scores = _unpad(scores_k, NC)
    boxes = _unpad(boxes_k, 4)
    # TODO(synk): Processor post-processing (score threshold + per-class NMS) and the
    # training branch (_train: prior matching + MultiBox loss) have no clean Pallas equivalent.
    return (scores, boxes), {}


# ------------------------------ prior boxes ------------------------------
def make_priors(H, W, A):
    ys = (jnp.arange(H, dtype=jnp.float32) + 0.5) / H
    xs = (jnp.arange(W, dtype=jnp.float32) + 0.5) / W
    cy, cx = jnp.meshgrid(ys, xs, indexing="ij")                    # (H, W)
    sizes = jnp.array([0.1, 0.15, 0.2, 0.3], dtype=jnp.float32)[:A]
    ratios = jnp.array([1.0, 2.0, 0.5, 1.0], dtype=jnp.float32)[:A]
    cx = jnp.broadcast_to(cx[:, :, None], (H, W, A))
    cy = jnp.broadcast_to(cy[:, :, None], (H, W, A))
    w = jnp.broadcast_to((sizes * jnp.sqrt(ratios))[None, None, :], (H, W, A))
    h = jnp.broadcast_to((sizes / jnp.sqrt(ratios))[None, None, :], (H, W, A))
    return jnp.stack([cx, cy, w, h], axis=-1).reshape(H * W * A, 4)


# --------------------------- pure-JAX reference ---------------------------
def reference(x_nhwc, params, priors):
    cls_map = jax.lax.conv_general_dilated(
        x_nhwc, params["w_cls"], (1, 1), "SAME",
        dimension_numbers=("NHWC", "HWIO", "NHWC")) + params["b_cls"]
    reg_map = jax.lax.conv_general_dilated(
        x_nhwc, params["w_reg"], (1, 1), "SAME",
        dimension_numbers=("NHWC", "HWIO", "NHWC")) + params["b_reg"]
    N = x_nhwc.shape[0]
    cls_logits = cls_map.reshape(N, -1, NUM_CLASSES)
    bbox_pred = reg_map.reshape(N, -1, 4)
    scores = jax.nn.softmax(cls_logits, axis=2)
    cxy = bbox_pred[..., :2] * CENTER_VAR * priors[None, :, 2:] + priors[None, :, :2]
    wh = jnp.exp(bbox_pred[..., 2:] * SIZE_VAR) * priors[None, :, 2:]
    boxes = jnp.concatenate([cxy - 0.5 * wh, cxy + 0.5 * wh], axis=-1)
    return scores, boxes


# ---------------------------------- main ----------------------------------
if __name__ == "__main__":
    key = jax.random.PRNGKey(0)
    N, C_in, H, W = 2, 32, 16, 16
    k1, k2, k3, k4, k5 = jax.random.split(key, 5)

    # PyTorch feature maps are NCHW; transpose to NHWC for the kernel path.
    x_nchw = jax.random.normal(k1, (N, C_in, H, W), dtype=jnp.float32)
    x_nhwc = jnp.transpose(x_nchw, (0, 2, 3, 1))

    params = dict(
        w_cls=0.05 * jax.random.normal(k2, (3, 3, C_in, ANCHORS * NUM_CLASSES), jnp.float32),
        b_cls=0.01 * jax.random.normal(k3, (ANCHORS * NUM_CLASSES,), jnp.float32),
        w_reg=0.05 * jax.random.normal(k4, (3, 3, C_in, ANCHORS * 4), jnp.float32),
        b_reg=0.01 * jax.random.normal(k5, (ANCHORS * 4,), jnp.float32),
    )
    priors = make_priors(H, W, ANCHORS)          # (H*W*A, 4) in (cx, cy, w, h)

    (scores, boxes), _ = box_head_forward(x_nhwc, params, priors)
    jax.block_until_ready((scores, boxes))

    ref_scores, ref_boxes = reference(x_nhwc, params, priors)
    assert jnp.allclose(scores, ref_scores, atol=1e-4, rtol=1e-4), \
        float(jnp.max(jnp.abs(scores - ref_scores)))
    assert jnp.allclose(boxes, ref_boxes, atol=1e-4, rtol=1e-4), \
        float(jnp.max(jnp.abs(boxes - ref_boxes)))

    print("KERNEL_OK")
</pallas_src>

<mosaic_0001>
module attributes {stable_mosaic.version = 11 : i64} {
  func.func @kernel(%arg0: i32, %arg1: memref<1x32x640xf32, #tpu.memory_space<vmem>>, %arg2: memref<9x80x32xf32, #tpu.memory_space<vmem>>, %arg3: memref<80x1xf32, #tpu.memory_space<vmem>>, %arg4: memref<32x384xf32, #tpu.memory_space<vmem>>, %arg5: memref<1x48x384xf32, #tpu.memory_space<vmem>>, %arg6: memref<1x32x384xf32, #tpu.memory_space<vmem>>) attributes {dimension_semantics = [#tpu.dimension_semantics<parallel>], iteration_bounds = array<i64: 2>, scalar_prefetch = 0 : i64, scratch_operands = 0 : i64, tpu.core_type = #tpu.core_type<tc>, window_params = [{transform_indices = @transform_0, window_bounds = array<i64: 1, 32, 640>}, {pipeline_mode = #tpu.pipeline_mode<synchronous>, transform_indices = @transform_1, window_bounds = array<i64: 9, 80, 32>}, {pipeline_mode = #tpu.pipeline_mode<synchronous>, transform_indices = @transform_2, window_bounds = array<i64: 80, 1>}, {pipeline_mode = #tpu.pipeline_mode<synchronous>, transform_indices = @transform_3, window_bounds = array<i64: 32, 384>}, {transform_indices = @transform_4, window_bounds = array<i64: 1, 48, 384>}, {transform_indices = @transform_5, window_bounds = array<i64: 1, 32, 384>}]} {
    %c0 = arith.constant 0 : index
    %c0_0 = arith.constant 0 : index
    %c109 = arith.constant 109 : index
    %0 = vector.load %arg1[%c0, %c0_0, %c109] : memref<1x32x640xf32, #tpu.memory_space<vmem>>, vector<1x32x384xf32>
    %1 = vector.shape_cast %0 : vector<1x32x384xf32> to vector<32x384xf32>
    %c0_1 = arith.constant 0 : index
    %c0_2 = arith.constant 0 : index
    %c0_3 = arith.constant 0 : index
    %2 = vector.load %arg2[%c0_1, %c0_2, %c0_3] : memref<9x80x32xf32, #tpu.memory_space<vmem>>, vector<1x80x32xf32>
    %3 = vector.shape_cast %2 : vector<1x80x32xf32> to vector<80x32xf32>
    %cst = arith.constant dense<0.000000e+00> : vector<80x384xf32>
    %4 = tpu.matmul %3, %1, %cst {dimension_numbers = #tpu.dot_dimension_numbers<[1], [0], [0], [1], [0, 0, 1, 1], [], []>} : vector<80x32xf32>, vector<32x384xf32>, vector<80x384xf32> -> vector<80x384xf32>
    %c0_4 = arith.constant 0 : index
    %c0_5 = arith.constant 0 : index
    %c110 = arith.constant 110 : index
    %5 = vector.load %arg1[%c0_4, %c0_5, %c110] : memref<1x32x640xf32, #tpu.memory_space<vmem>>, vector<1x32x384xf32>
    %6 = vector.shape_cast %5 : vector<1x32x384xf32> to vector<32x384xf32>
    %c1 = arith.constant 1 : index
    %c0_6 = arith.constant 0 : index
    %c0_7 = arith.constant 0 : index
    %7 = vector.load %arg2[%c1, %c0_6, %c0_7] : memref<9x80x32xf32, #tpu.memory_space<vmem>>, vector<1x80x32xf32>
    %8 = vector.shape_cast %7 : vector<1x80x32xf32> to vector<80x32xf32>
    %cst_8 = arith.constant dense<0.000000e+00> : vector<80x384xf32>
    %9 = tpu.matmul %8, %6, %cst_8 {dimension_numbers = #tpu.dot_dimension_numbers<[1], [0], [0], [1], [0, 0, 1, 1], [], []>} : vector<80x32xf32>, vector<32x384xf32>, vector<80x384xf32> -> vector<80x384xf32>
    %10 = arith.addf %4, %9 : vector<80x384xf32>
    %c0_9 = arith.constant 0 : index
    %c0_10 = arith.constant 0 : index
    %c111 = arith.constant 111 : index
    %11 = vector.load %arg1[%c0_9, %c0_10, %c111] : memref<1x32x640xf32, #tpu.memory_space<vmem>>, vector<1x32x384xf32>
    %12 = vector.shape_cast %11 : vector<1x32x384xf32> to vector<32x384xf32>
    %c2 = arith.constant 2 : index
    %c0_11 = arith.constant 0 : index
    %c0_12 = arith.constant 0 : index
    %13 = vector.load %arg2[%c2, %c0_11, %c0_12] : memref<9x80x32xf32, #tpu.memory_space<vmem>>, vector<1x80x32xf32>
    %14 = vector.shape_cast %13 : vector<1x80x32xf32> to vector<80x32xf32>
    %cst_13 = arith.constant dense<0.000000e+00> : vector<80x384xf32>
    %15 = tpu.matmul %14, %12, %cst_13 {dimension_numbers = #tpu.dot_dimension_numbers<[1], [0], [0], [1], [0, 0, 1, 1], [], []>} : vector<80x32xf32>, vector<32x384xf32>, vector<80x384xf32> -> vector<80x384xf32>
    %16 = arith.addf %10, %15 : vector<80x384xf32>
    %c0_14 = arith.constant 0 : index
    %c0_15 = arith.constant 0 : index
    %c127 = arith.constant 127 : index
    %17 = vector.load %arg1[%c0_14, %c0_15, %c127] : memref<1x32x640xf32, #tpu.memory_space<vmem>>, vector<1x32x384xf32>
    %18 = vector.shape_cast %17 : vector<1x32x384xf32> to vector<32x384xf32>
    %c3 = arith.constant 3 : index
    %c0_16 = arith.constant 0 : index
    %c0_17 = arith.constant 0 : index
    %19 = vector.load %arg2[%c3, %c0_16, %c0_17] : memref<9x80x32xf32, #tpu.memory_space<vmem>>, vector<1x80x32xf32>
    %20 = vector.shape_cast %19 : vector<1x80x32xf32> to vector<80x32xf32>
    %cst_18 = arith.constant dense<0.000000e+00> : vector<80x384xf32>
    %21 = tpu.matmul %20, %18, %cst_18 {dimension_numbers = #tpu.dot_dimension_numbers<[1], [0], [0], [1], [0, 0, 1, 1], [], []>} : vector<80x32xf32>, vector<32x384xf32>, vector<80x384xf32> -> vector<80x384xf32>
    %22 = arith.addf %16, %21 : vector<80x384xf32>
    %c0_19 = arith.constant 0 : index
    %c0_20 = arith.constant 0 : index
    %c128 = arith.constant 128 : index
    %23 = vector.load %arg1[%c0_19, %c0_20, %c128] : memref<1x32x640xf32, #tpu.memory_space<vmem>>, vector<1x32x384xf32>
    %24 = vector.shape_cast %23 : vector<1x32x384xf32> to vector<32x384xf32>
    %c4 = arith.constant 4 : index
    %c0_21 = arith.constant 0 : index
    %c0_22 = arith.constant 0 : index
    %25 = vector.load %arg2[%c4, %c0_21, %c0_22] : memref<9x80x32xf32, #tpu.memory_space<vmem>>, vector<1x80x32xf32>
    %26 = vector.shape_cast %25 : vector<1x80x32xf32> to vector<80x32xf32>
    %cst_23 = arith.constant dense<0.000000e+00> : vector<80x384xf32>
    %27 = tpu.matmul %26, %24, %cst_23 {dimension_numbers = #tpu.dot_dimension_numbers<[1], [0], [0], [1], [0, 0, 1, 1], [], []>} : vector<80x32xf32>, vector<32x384xf32>, vector<80x384xf32> -> vector<80x384xf32>
    %28 = arith.addf %22, %27 : vector<80x384xf32>
    %c0_24 = arith.constant 0 : index
    %c0_25 = arith.constant 0 : index
    %c129 = arith.constant 129 : index
    %29 = vector.load %arg1[%c0_24, %c0_25, %c129] : memref<1x32x640xf32, #tpu.memory_space<vmem>>, vector<1x32x384xf32>
    %30 = vector.shape_cast %29 : vector<1x32x384xf32> to vector<32x384xf32>
    %c5 = arith.constant 5 : index
    %c0_26 = arith.constant 0 : index
    %c0_27 = arith.constant 0 : index
    %31 = vector.load %arg2[%c5, %c0_26, %c0_27] : memref<9x80x32xf32, #tpu.memory_space<vmem>>, vector<1x80x32xf32>
    %32 = vector.shape_cast %31 : vector<1x80x32xf32> to vector<80x32xf32>
    %cst_28 = arith.constant dense<0.000000e+00> : vector<80x384xf32>
    %33 = tpu.matmul %32, %30, %cst_28 {dimension_numbers = #tpu.dot_dimension_numbers<[1], [0], [0], [1], [0, 0, 1, 1], [], []>} : vector<80x32xf32>, vector<32x384xf32>, vector<80x384xf32> -> vector<80x384xf32>
    %34 = arith.addf %28, %33 : vector<80x384xf32>
    %c0_29 = arith.constant 0 : index
    %c0_30 = arith.constant 0 : index
    %c145 = arith.constant 145 : index
    %35 = vector.load %arg1[%c0_29, %c0_30, %c145] : memref<1x32x640xf32, #tpu.memory_space<vmem>>, vector<1x32x384xf32>
    %36 = vector.shape_cast %35 : vector<1x32x384xf32> to vector<32x384xf32>
    %c6 = arith.constant 6 : index
    %c0_31 = arith.constant 0 : index
    %c0_32 = arith.constant 0 : index
    %37 = vector.load %arg2[%c6, %c0_31, %c0_32] : memref<9x80x32xf32, #tpu.memory_space<vmem>>, vector<1x80x32xf32>
    %38 = vector.shape_cast %37 : vector<1x80x32xf32> to vector<80x32xf32>
    %cst_33 = arith.constant dense<0.000000e+00> : vector<80x384xf32>
    %39 = tpu.matmul %38, %36, %cst_33 {dimension_numbers = #tpu.dot_dimension_numbers<[1], [0], [0], [1], [0, 0, 1, 1], [], []>} : vector<80x32xf32>, vector<32x384xf32>, vector<80x384xf32> -> vector<80x384xf32>
    %40 = arith.addf %34, %39 : vector<80x384xf32>
    %c0_34 = arith.constant 0 : index
    %c0_35 = arith.constant 0 : index
    %c146 = arith.constant 146 : index
    %41 = vector.load %arg1[%c0_34, %c0_35, %c146] : memref<1x32x640xf32, #tpu.memory_space<vmem>>, vector<1x32x384xf32>
    %42 = vector.shape_cast %41 : vector<1x32x384xf32> to vector<32x384xf32>
    %c7 = arith.constant 7 : index
    %c0_36 = arith.constant 0 : index
    %c0_37 = arith.constant 0 : index
    %43 = vector.load %arg2[%c7, %c0_36, %c0_37] : memref<9x80x32xf32, #tpu.memory_space<vmem>>, vector<1x80x32xf32>
    %44 = vector.shape_cast %43 : vector<1x80x32xf32> to vector<80x32xf32>
    %cst_38 = arith.constant dense<0.000000e+00> : vector<80x384xf32>
    %45 = tpu.matmul %44, %42, %cst_38 {dimension_numbers = #tpu.dot_dimension_numbers<[1], [0], [0], [1], [0, 0, 1, 1], [], []>} : vector<80x32xf32>, vector<32x384xf32>, vector<80x384xf32> -> vector<80x384xf32>
    %46 = arith.addf %40, %45 : vector<80x384xf32>
    %c0_39 = arith.constant 0 : index
    %c0_40 = arith.constant 0 : index
    %c147 = arith.constant 147 : index
    %47 = vector.load %arg1[%c0_39, %c0_40, %c147] : memref<1x32x640xf32, #tpu.memory_space<vmem>>, vector<1x32x384xf32>
    %48 = vector.shape_cast %47 : vector<1x32x384xf32> to vector<32x384xf32>
    %c8 = arith.constant 8 : index
    %c0_41 = arith.constant 0 : index
    %c0_42 = arith.constant 0 : index
    %49 = vector.load %arg2[%c8, %c0_41, %c0_42] : memref<9x80x32xf32, #tpu.memory_space<vmem>>, vector<1x80x32xf32>
    %50 = vector.shape_cast %49 : vector<1x80x32xf32> to vector<80x32xf32>
    %cst_43 = arith.constant dense<0.000000e+00> : vector<80x384xf32>
    %51 = tpu.matmul %50, %48, %cst_43 {dimension_numbers = #tpu.dot_dimension_numbers<[1], [0], [0], [1], [0, 0, 1, 1], [], []>} : vector<80x32xf32>, vector<32x384xf32>, vector<80x384xf32> -> vector<80x384xf32>
    %52 = arith.addf %46, %51 : vector<80x384xf32>
    %c0_44 = arith.constant 0 : index
    %c0_45 = arith.constant 0 : index
    %53 = vector.load %arg3[%c0_44, %c0_45] : memref<80x1xf32, #tpu.memory_space<vmem>>, vector<80x1xf32>
    %54 = vector.broadcast %53 : vector<80x1xf32> to vector<80x384xf32>
    %55 = arith.addf %52, %54 : vector<80x384xf32>
    %56 = vector.extract_strided_slice %55 {offsets = [0, 0], sizes = [48, 384], strides = [1, 1]} : vector<80x384xf32> to vector<48x384xf32>
    %57 = vector.extract_strided_slice %56 {offsets = [0, 0], sizes = [8, 384], strides = [1, 1]} : vector<48x384xf32> to vector<8x384xf32>
    %58 = vector.extract_strided_slice %56 {offsets = [8, 0], sizes = [8, 384], strides = [1, 1]} : vector<48x384xf32> to vector<8x384xf32>
    %59 = arith.maximumf %57, %58 : vector<8x384xf32>
    %60 = vector.extract_strided_slice %56 {offsets = [16, 0], sizes = [8, 384], strides = [1, 1]} : vector<48x384xf32> to vector<8x384xf32>
    %61 = arith.maximumf %59, %60 : vector<8x384xf32>
    %62 = vector.extract_strided_slice %56 {offsets = [24, 0], sizes = [8, 384], strides = [1, 1]} : vector<48x384xf32> to vector<8x384xf32>
    %63 = arith.maximumf %61, %62 : vector<8x384xf32>
    %64 = vector.extract_strided_slice %56 {offsets = [32, 0], sizes = [8, 384], strides = [1, 1]} : vector<48x384xf32> to vector<8x384xf32>
    %65 = arith.maximumf %63, %64 : vector<8x384xf32>
    %66 = vector.extract_strided_slice %56 {offsets = [40, 0], sizes = [8, 384], strides = [1, 1]} : vector<48x384xf32> to vector<8x384xf32>
    %67 = arith.maximumf %65, %66 : vector<8x384xf32>
    %68 = vector.extract_strided_slice %56 {offsets = [0, 0], sizes = [8, 384], strides = [1, 1]} : vector<48x384xf32> to vector<8x384xf32>
    %69 = arith.subf %68, %67 : vector<8x384xf32>
    %70 = vector.extract_strided_slice %56 {offsets = [8, 0], sizes = [8, 384], strides = [1, 1]} : vector<48x384xf32> to vector<8x384xf32>
    %71 = arith.subf %70, %67 : vector<8x384xf32>
    %72 = vector.extract_strided_slice %56 {offsets = [16, 0], sizes = [8, 384], strides = [1, 1]} : vector<48x384xf32> to vector<8x384xf32>
    %73 = arith.subf %72, %67 : vector<8x384xf32>
    %74 = vector.extract_strided_slice %56 {offsets = [24, 0], sizes = [8, 384], strides = [1, 1]} : vector<48x384xf32> to vector<8x384xf32>
    %75 = arith.subf %74, %67 : vector<8x384xf32>
    %76 = vector.extract_strided_slice %56 {offsets = [32, 0], sizes = [8, 384], strides = [1, 1]} : vector<48x384xf32> to vector<8x384xf32>
    %77 = arith.subf %76, %67 : vector<8x384xf32>
    %78 = vector.extract_strided_slice %56 {offsets = [40, 0], sizes = [8, 384], strides = [1, 1]} : vector<48x384xf32> to vector<8x384xf32>
    %79 = arith.subf %78, %67 : vector<8x384xf32>
    %80 = tpu.concatenate %69, %71, %73, %75, %77, %79 in 0 : vector<8x384xf32>, vector<8x384xf32>, vector<8x384xf32>, vector<8x384xf32>, vector<8x384xf32>, vector<8x384xf32> -> vector<48x384xf32>
    %81 = math.exp %80 : vector<48x384xf32>
    %82 = vector.extract_strided_slice %81 {offsets = [0, 0], sizes = [8, 384], strides = [1, 1]} : vector<48x384xf32> to vector<8x384xf32>
    %83 = vector.extract_strided_slice %81 {offsets = [8, 0], sizes = [8, 384], strides = [1, 1]} : vector<48x384xf32> to vector<8x384xf32>
    %84 = arith.addf %82, %83 : vector<8x384xf32>
    %85 = vector.extract_strided_slice %81 {offsets = [16, 0], sizes = [8, 384], strides = [1, 1]} : vector<48x384xf32> to vector<8x384xf32>
    %86 = arith.addf %84, %85 : vector<8x384xf32>
    %87 = vector.extract_strided_slice %81 {offsets = [24, 0], sizes = [8, 384], strides = [1, 1]} : vector<48x384xf32> to vector<8x384xf32>
    %88 = arith.addf %86, %87 : vector<8x384xf32>
    %89 = vector.extract_strided_slice %81 {offsets = [32, 0], sizes = [8, 384], strides = [1, 1]} : vector<48x384xf32> to vector<8x384xf32>
    %90 = arith.addf %88, %89 : vector<8x384xf32>
    %91 = vector.extract_strided_slice %81 {offsets = [40, 0], sizes = [8, 384], strides = [1, 1]} : vector<48x384xf32> to vector<8x384xf32>
    %92 = arith.addf %90, %91 : vector<8x384xf32>
    %93 = tpu.reciprocal %92 {approx = true} : vector<8x384xf32> -> vector<8x384xf32>
    %94 = arith.mulf %92, %93 : vector<8x384xf32>
    %cst_46 = arith.constant 2.000000e+00 : f32
    %95 = vector.broadcast %cst_46 : f32 to vector<8x384xf32>
    %96 = arith.subf %95, %94 : vector<8x384xf32>
    %97 = arith.mulf %93, %96 : vector<8x384xf32>
    %98 = tpu.concatenate %97, %97, %97, %97, %97, %97 in 0 : vector<8x384xf32>, vector<8x384xf32>, vector<8x384xf32>, vector<8x384xf32>, vector<8x384xf32>, vector<8x384xf32> -> vector<48x384xf32>
    %99 = arith.mulf %81, %98 : vector<48x384xf32>
    %c0_47 = arith.constant 0 : index
    %c0_48 = arith.constant 0 : index
    %c0_49 = arith.constant 0 : index
    %100 = vector.load %arg5[%c0_47, %c0_48, %c0_49] : memref<1x48x384xf32, #tpu.memory_space<vmem>>, vector<1x48x384xf32>
    %101 = vector.shape_cast %100 : vector<1x48x384xf32> to vector<48x384xf32>
    %102 = vector.shape_cast %99 : vector<48x384xf32> to vector<1x48x384xf32>
    tpu.vector_store %arg5[%c0_47, %c0_48, %c0_49], %102 {strides = array<i32>} : memref<1x48x384xf32, #tpu.memory_space<vmem>>, vector<1x48x384xf32>,
    %103 = vector.extract_strided_slice %55 {offsets = [48, 0], sizes = [32, 384], strides = [1, 1]} : vector<80x384xf32> to vector<32x384xf32>
    %c0_50 = arith.constant 0 : index
    %c0_51 = arith.constant 0 : index
    %104 = vector.load %arg4[%c0_50, %c0_51] : memref<32x384xf32, #tpu.memory_space<vmem>>, vector<32x384xf32>
    %105 = vector.extract_strided_slice %103 {offsets = [0, 0], sizes = [16, 384], strides = [1, 1]} : vector<32x384xf32> to vector<16x384xf32>
    %cst_52 = arith.constant 1.000000e-01 : f32
    %106 = vector.broadcast %cst_52 : f32 to vector<16x384xf32>
    %107 = arith.mulf %105, %106 : vector<16x384xf32>
    %108 = vector.extract_strided_slice %104 {offsets = [16, 0], sizes = [16, 384], strides = [1, 1]} : vector<32x384xf32> to vector<16x384xf32>
    %109 = arith.mulf %107, %108 : vector<16x384xf32>
    %110 = vector.extract_strided_slice %104 {offsets = [0, 0], sizes = [16, 384], strides = [1, 1]} : vector<32x384xf32> to vector<16x384xf32>
    %111 = arith.addf %109, %110 : vector<16x384xf32>
    %112 = vector.extract_strided_slice %103 {offsets = [16, 0], sizes = [16, 384], strides = [1, 1]} : vector<32x384xf32> to vector<16x384xf32>
    %cst_53 = arith.constant 2.000000e-01 : f32
    %113 = vector.broadcast %cst_53 : f32 to vector<16x384xf32>
    %114 = arith.mulf %112, %113 : vector<16x384xf32>
    %115 = math.exp %114 : vector<16x384xf32>
    %116 = vector.extract_strided_slice %104 {offsets = [16, 0], sizes = [16, 384], strides = [1, 1]} : vector<32x384xf32> to vector<16x384xf32>
    %117 = arith.mulf %115, %116 : vector<16x384xf32>
    %cst_54 = arith.constant 5.000000e-01 : f32
    %118 = vector.broadcast %cst_54 : f32 to vector<16x384xf32>
    %119 = arith.mulf %118, %117 : vector<16x384xf32>
    %120 = arith.subf %111, %119 : vector<16x384xf32>
    %cst_55 = arith.constant 5.000000e-01 : f32
    %121 = vector.broadcast %cst_55 : f32 to vector<16x384xf32>
    %122 = arith.mulf %121, %117 : vector<16x384xf32>
    %123 = arith.addf %111, %122 : vector<16x384xf32>
    %124 = tpu.concatenate %120, %123 in 0 : vector<16x384xf32>, vector<16x384xf32> -> vector<32x384xf32>
    %c0_56 = arith.constant 0 : index
    %c0_57 = arith.constant 0 : index
    %c0_58 = arith.constant 0 : index
    %125 = vector.load %arg6[%c0_56, %c0_57, %c0_58] : memref<1x32x384xf32, #tpu.memory_space<vmem>>, vector<1x32x384xf32>
    %126 = vector.shape_cast %125 : vector<1x32x384xf32> to vector<32x384xf32>
    %127 = vector.shape_cast %124 : vector<32x384xf32> to vector<1x32x384xf32>
    tpu.vector_store %arg6[%c0_56, %c0_57, %c0_58], %127 {strides = array<i32>} : memref<1x32x384xf32, #tpu.memory_space<vmem>>, vector<1x32x384xf32>,
    return
  }
  func.func @transform_0(%arg0: i32) -> (i32, i32, i32) {
    %c0_i32 = arith.constant 0 : i32
    %c0_i32_0 = arith.constant 0 : i32
    %c0_i32_1 = arith.constant 0 : i32
    return %arg0, %c0_i32, %c0_i32_0 : i32, i32, i32
  }
  func.func @transform_1(%arg0: i32) -> (i32, i32, i32) {
    %c0_i32 = arith.constant 0 : i32
    %c0_i32_0 = arith.constant 0 : i32
    %c0_i32_1 = arith.constant 0 : i32
    %c0_i32_2 = arith.constant 0 : i32
    return %c0_i32, %c0_i32_0, %c0_i32_1 : i32, i32, i32
  }
  func.func @transform_2(%arg0: i32) -> (i32, i32) {
    %c0_i32 = arith.constant 0 : i32
    %c0_i32_0 = arith.constant 0 : i32
    %c0_i32_1 = arith.constant 0 : i32
    return %c0_i32, %c0_i32_0 : i32, i32
  }
  func.func @transform_3(%arg0: i32) -> (i32, i32) {
    %c0_i32 = arith.constant 0 : i32
    %c0_i32_0 = arith.constant 0 : i32
    %c0_i32_1 = arith.constant 0 : i32
    return %c0_i32, %c0_i32_0 : i32, i32
  }
  func.func @transform_4(%arg0: i32) -> (i32, i32, i32) {
    %c0_i32 = arith.constant 0 : i32
    %c0_i32_0 = arith.constant 0 : i32
    %c0_i32_1 = arith.constant 0 : i32
    return %arg0, %c0_i32, %c0_i32_0 : i32, i32, i32
  }
  func.func @transform_5(%arg0: i32) -> (i32, i32, i32) {
    %c0_i32 = arith.constant 0 : i32
    %c0_i32_0 = arith.constant 0 : i32
    %c0_i32_1 = arith.constant 0 : i32
    return %arg0, %c0_i32, %c0_i32_0 : i32, i32, i32
  }
}

</mosaic_0001>

<bundles_post_ra>
// kernel: tpu_custom_call.1
= control target key start
LH: loop header
LB: loop body
LE: loop exit
PB: predicated region body
PF: predicated region fallthrough
CT: control target
= control target key end

     0   :  { %11 = vsyncpa [#allocation3], 0  ;;  %s7324_s0 = inlined_call_operand.vmem [shape: f32[2,32,640], index: 0, kind: input, shape index: {}]   ;;  %s7325_s1 = inlined_call_operand.vmem [shape: f32[9,80,32], index: 1, kind: input, shape index: {}]   ;;  %s7326_s2 = inlined_call_operand.vmem [shape: f32[80,1], index: 2, kind: input, shape index: {}]   ;;  %s7327_s3 = inlined_call_operand.vmem [shape: f32[32,384], index: 3, kind: input, shape index: {}]   ;;  %s7328_s4 = inlined_call_operand.hbm [shape: f32[2,48,384], index: 4, kind: output, shape index: {0}]   ;;  %s7329_s5 = inlined_call_operand.hbm [shape: f32[2,32,384], index: 5, kind: output, shape index: {1}]  }
   0x1   :  { %13 = vsyncpa [#allocation3 + $0x1], 0 }
   0x2   :  { %14 = vsyncpa [#allocation5], 0 }
   0x3   :  { %16 = vsyncpa [#allocation5 + $0x1], 0  ;;  %s5499_s18 = smov 0   ;;  %s5501_s19 = smov 0  }
   0x4   :  { %s5503_s20 = smov 0   ;;  %s5505_s21 = smov 0  }
   0x5 LB: > { %s5520_s22 = sadd.s32 4294967295, %s5453_s21   ;;  %s3928_s23 = sadd.s32 4294967294, %s5453_s21   ;;  %s5453_s21 = sphi %s5505_s21, %s7378_s21   ;;  %s5449_s20 = sphi %s5503_s20, %s7377_s20   ;;  %s5445_s19 = sphi %s5501_s19, %s7376_s19   ;;  %s5441_s18 = sphi %s5499_s18, %s7375_s18  }
   0x6   : > { %s5524_s24 = sadd.s32 1, %s5453_s21   ;;  %s118_s25 = sadd.s32 1, %s5449_s20 }
   0x7   : > { %s115_s26 = ssub.s32 %s5453_s21, %s5524_s24  ;;  %p128_p0 = scmp.ne.s32.totalorder %s5449_s20, %s5445_s19 }
   0x8   : > { %p116_p1 = scmp.eq.s32.totalorder %s115_s26, 0  ;;  %p129_p2 = scmp.eq.s32.totalorder %s5520_s22, 1 }
   0x9   : > { %p134_p3 = scmp.ne.s32.totalorder %s5445_s19, %s5441_s18  ;;  %p135_p4 = scmp.eq.s32.totalorder %s3928_s23, 1 }
   0xa   : > { %s5535_s27 = scalar_select %p116_p1, %s5449_s20, %s118_s25  }
   0xb   : > { %p5537_p5 = por %p129_p2, %p128_p0  ;;  %p5541_p6 = por %p135_p4, %p134_p3 }
   0xc   : > { %p3931_p7 = scmp.ge.s32.totalorder %s5453_s21, 1  ;;  %p196_p8 = scmp.lt.s32.totalorder %s5453_s21, 3 }
   0xe   : > { %p197_p9 = pnand %p3931_p7, %p196_p8 }
  0x10   : > { %200 = sbr.rel (%p197_p9) target bundleno = 736 (0x2e0), region = 36 }
  0x17   : > { %p229_p10 = scmp.lt.s32.totalorder %s5520_s22, 1  ;;  %s5455_s10 = smov 18   ;;  %v7340_v17 = vmov 0.0   ;;  %vm319_vm0 = vcmask 146432   ;;  %vm985_vm1 = vcmask 138240   ;;  %vm344_vm2 = vcmask 261120  }
  0x18   : > { %439 = vmatprep.mubr.f32.mxu1 %v7340_v17  ;;  %1104 = vmatprep.mubr.f32.mxu0 %v7340_v17  ;;  %s5457_s11 = smov 17   ;;  %s5458_s12 = smov 1   ;;  %vm1353_vm3 = vcmask 7168   ;;  %vm647_vm4 = vcmask 154624   ;;  %vm2064_vm5 = vcmask 1039360   ;;  %vm2432_vm6 = vcmask 908288  }
  0x19   : > { %s230_s30 = scalar_select %p229_p10, %s5520_s22, 1  ;;  %vm2800_vm7 = vcmask 900096   ;;  %vm3168_vm8 = vcmask 891904  }
  0x1a   : > { %s5459_s13 = smov 19   ;;  %s5460_s14 = smov 127  }
  0x1b   : > { %s4920_s6 = smul.u32 160, %s230_s30  ;;  %s5461_s15 = smov 111  }
  0x1c   : > { %s5462_s16 = smov 110   ;;  %s5463_s17 = smov 109  }
  0x1d   : > { %s5552_s9 = scalar_lea.vmem %s7324_s0, %s4920_s6  ;;  %s7117_s30 = sand.u32 1, %s5445_s19  }
  0x1e   : > { %v5555_v0 = vld [vmem:[%s5552_s9 + $0x8] sm:$0xff]  ;;  %v5558_v1 = vld [vmem:[%s5552_s9 + $0x10] sm:$0xff]  ;;  %v234_v2 = vld [vmem:[%s5552_s9] sm:$0xff]  ;;  %s4921_s26 = smul.u32 2304, %s5520_s22  ;;  %s3805_s8 = scalar_lea.sflag [#allocation5], %s7117_s30 }
  0x1f   : > { %v4979_v3 = vpack.i.bf16 %v5558_v1, %v5555_v0  ;;  %v238_v4 = vld [vmem:[%s5552_s9 + $0x28] sm:$0xff]  ;;  %v5565_v5 = vld [vmem:[%s5552_s9 + $0x30] sm:$0xff]  ;;  %v5568_v6 = vld [vmem:[%s5552_s9 + $0x38] sm:$0xff] }
  0x20   : > { %v4989_v7 = vpack.i.bf16 %v238_v4, %v234_v2  ;;  %v5571_v8 = vld [vmem:[%s5552_s9 + $0x58] sm:$0xff]  ;;  %v5574_v9 = vld [vmem:[%s5552_s9 + $0x60] sm:$0xff]  ;;  %v4984_v10 = vpack.i.bf16 %v5568_v6, %v5565_v5  ;;  %v5586_v13 = vld [vmem:[%s5552_s9 + $0x88] sm:$0xff]  ;;  %v5129_v27 = vpack.i.bf16 %v5565_v5, %v5555_v0  ;;  %v4594_v28 = vpack.c.bf16 %v5568_v6, %v5558_v1 }
  0x21   : > { %4980 = vrot.lane.b32.xlu0 %v4979_v3, %s5455_s10  ;;  %v4994_v11 = vpack.i.bf16 %v5574_v9, %v5571_v8  ;;  %v5583_v12 = vld [vmem:[%s5552_s9 + $0x80] sm:$0xff]  ;;  %v242_v15 = vld [vmem:[%s5552_s9 + $0x50] sm:$0xff]  ;;  %v246_v16 = vld [vmem:[%s5552_s9 + $0x78] sm:$0xff] }
  0x22   : > { %4990 = vrot.lane.b32.xlu1 %v4989_v7, %s5455_s10  ;;  %v4999_v14 = vpack.i.bf16 %v5586_v13, %v5583_v12  ;;  %v5014_v18 = vpack.i.bf16 %v246_v16, %v242_v15  ;;  %v237_v19 = vld [vmem:[%s5552_s9 + $0x18] sm:$0xff]  ;;  %v241_v20 = vld [vmem:[%s5552_s9 + $0x40] sm:$0xff]  ;;  %v245_v22 = vld [vmem:[%s5552_s9 + $0x68] sm:$0xff]  ;;  %v5144_v32 = vpack.i.bf16 %v5583_v12, %v5571_v8 }
  0x23   : > { %v5054_v21 = vpack.i.bf16 %v241_v20, %v237_v19  ;;  %v249_v23 = vld [vmem:[%s5552_s9 + $0x90] sm:$0xff]  ;;  %v5119_v25 = vpack.i.bf16 %v237_v19, %v5558_v1  ;;  %v5124_v26 = vpack.i.bf16 %v241_v20, %v5568_v6  ;;  %v5134_v30 = vpack.i.bf16 %v245_v22, %v5574_v9  ;;  %v1992_v33 = vld [vmem:[%s5552_s9 + $0x20] sm:$0xff]  ;;  %v1996_v34 = vld [vmem:[%s5552_s9 + $0x48] sm:$0xff] }
  0x24   : > { %v5074_v24 = vpack.i.bf16 %v249_v23, %v245_v22  ;;  %v5139_v31 = vpack.i.bf16 %v249_v23, %v5586_v13  ;;  %v2000_v35 = vld [vmem:[%s5552_s9 + $0x70] sm:$0xff]  ;;  %v2004_v36 = vld [vmem:[%s5552_s9 + $0x98] sm:$0xff]  ;;  %v5199_v37 = vpack.i.bf16 %v1996_v34, %v1992_v33 }
  0x25   : > { %4985 = vrot.lane.b32.xlu0 %v4984_v10, %s5455_s10  ;;  %v5204_v38 = vpack.i.bf16 %v2004_v36, %v2000_v35  ;;  %v5913_v1 = vld [vmem:[%s7325_s1 + $0xd0] sm:$0xff] }
  0x26   : > { %4995 = vrot.lane.b32.xlu1 %v4994_v11, %s5455_s10 }
  0x29   : > { %5000 = vrot.lane.b32.xlu0 %v4999_v14, %s5455_s10 }
  0x2a   : > { %5005 = vrot.lane.b32.xlu1 %v4979_v3, %s5457_s11 }
  0x2d   : > { %5010 = vrot.lane.b32.xlu0 %v4984_v10, %s5457_s11 }
  0x2e   : > { %5015 = vrot.lane.b32.xlu1 %v5014_v18, %s5455_s10 }
  0x31   : > { %5020 = vrot.lane.b32.xlu0 %v4989_v7, %s5457_s11 }
  0x32   : > { %5025 = vrot.lane.b32.xlu1 %v4994_v11, %s5457_s11 }
  0x35   : > { %5030 = vrot.lane.b32.xlu0 %v4999_v14, %s5457_s11 }
  0x36   : > { %5035 = vrot.lane.b32.xlu1 %v5014_v18, %s5457_s11 }
  0x39   : > { %5040 = vrot.lane.b32.xlu0 %v4979_v3, %s5458_s12 }
  0x3a   : > { %5045 = vrot.lane.b32.xlu1 %v4984_v10, %s5458_s12 }
  0x3d   : > { %5050 = vrot.lane.b32.xlu0 %v4989_v7, %s5458_s12 }
  0x3e   : > { %5055 = vrot.lane.b32.xlu1 %v5054_v21, %s5455_s10 }
  0x41   : > { %5060 = vrot.lane.b32.xlu0 %v4994_v11, %s5458_s12 }
  0x42   : > { %5065 = vrot.lane.b32.xlu1 %v4999_v14, %s5458_s12 }
  0x45   : > { %5070 = vrot.lane.b32.xlu0 %v5014_v18, %s5458_s12 }
  0x46   : > { %5075 = vrot.lane.b32.xlu1 %v5074_v24, %s5455_s10 }
  0x49   : > { %5080 = vrot.lane.b32.xlu0 %v4979_v3, %s5459_s13 }
  0x4a   : > { %5085 = vrot.lane.b32.xlu1 %v4984_v10, %s5459_s13 }
  0x4d   : > { %5090 = vrot.lane.b32.xlu0 %v4989_v7, %s5459_s13 }
  0x4e   : > { %5095 = vrot.lane.b32.xlu1 %v4994_v11, %s5459_s13 }
  0x51   : > { %5100 = vrot.lane.b32.xlu0 %v4999_v14, %s5459_s13 }
  0x52   : > { %5105 = vrot.lane.b32.xlu1 %v5014_v18, %s5459_s13 }
  0x55   : > { %5110 = vrot.lane.b32.xlu0 %v5054_v21, %s5459_s13 }
  0x56   : > { %5115 = vrot.lane.b32.xlu1 %v5074_v24, %s5459_s13 }
  0x59   : > { %5120 = vrot.lane.b32.xlu0 %v5119_v25, %s5460_s14 }
  0x5a   : > { %5125 = vrot.lane.b32.xlu1 %v5124_v26, %s5460_s14 }
  0x5d   : > { %5130 = vrot.lane.b32.xlu0 %v5129_v27, %s5460_s14 }
  0x5e   : > { %5135 = vrot.lane.b32.xlu1 %v5134_v30, %s5460_s14 }
  0x61   : > { %5140 = vrot.lane.b32.xlu0 %v5139_v31, %s5460_s14 }
  0x62   : > { %5145 = vrot.lane.b32.xlu1 %v5144_v32, %s5460_s14 }
  0x65   : > { %5150 = vrot.lane.b32.xlu0 %v5054_v21, %s5457_s11 }
  0x66   : > { %5155 = vrot.lane.b32.xlu1 %v5074_v24, %s5457_s11  ;;  %s4919_s11 = smul.u32 96, %s7117_s30 }
  0x68   : > { %s7166_s7 = scalar_lea.vmem [#allocation4], %s4919_s11  ;;  %s5465_s11 = smov [#allocation4]  }
  0x69   : > { %5160 = vrot.lane.b32.xlu0 %v5054_v21, %s5458_s12 }
  0x6a   : > { %5165 = vrot.lane.b32.xlu1 %v5074_v24, %s5458_s12  ;;  %s5363_s12 = sshll.u32 %s5465_s11, 4  ;;  %s5364_s12 = int_to_ptr.vmem [resolvable:$false] %s5363_s12 }
  0x6b   : > { %s5365_s13 = scalar_lea.vmem %s5364_s12, 3072 }
  0x6d   : > { %5170 = vrot.lane.b32.xlu0 %v5119_v25, %s5461_s15 }
  0x6e   : > { %5175 = vrot.lane.b32.xlu1 %v5124_v26, %s5461_s15 }
  0x71   : > { %5180 = vrot.lane.b32.xlu0 %v5129_v27, %s5461_s15 }
  0x72   : > { %5185 = vrot.lane.b32.xlu1 %v5134_v30, %s5461_s15 }
  0x75   : > { %5190 = vrot.lane.b32.xlu0 %v5139_v31, %s5461_s15 }
  0x76   : > { %5195 = vrot.lane.b32.xlu1 %v5144_v32, %s5461_s15 }
  0x79   : > { %5200 = vrot.lane.b32.xlu0 %v5199_v37, %s5460_s14 }
  0x7a   : > { %5205 = vrot.lane.b32.xlu1 %v5204_v38, %s5460_s14 }
  0x7d   : > { %5210 = vrot.lane.b32.xlu0 %v5119_v25, %s5462_s16 }
  0x7e   : > { %5215 = vrot.lane.b32.xlu1 %v5124_v26, %s5462_s16 }
  0x81   : > { %5220 = vrot.lane.b32.xlu0 %v5129_v27, %s5462_s16 }
  0x82   : > { %5225 = vrot.lane.b32.xlu1 %v5134_v30, %s5462_s16 }
  0x85   : > { %5230 = vrot.lane.b32.xlu0 %v5139_v31, %s5462_s16 }
  0x86   : > { %5235 = vrot.lane.b32.xlu1 %v5144_v32, %s5462_s16 }
  0x89   : > { %5240 = vrot.lane.b32.xlu0 %v5199_v37, %s5461_s15 }
  0x8a   : > { %5245 = vrot.lane.b32.xlu1 %v5204_v38, %s5461_s15 }
  0x8d   : > { %5250 = vrot.lane.b32.xlu0 %v5199_v37, %s5462_s16 }
  0x8e   : > { %5255 = vrot.lane.b32.xlu1 %v5204_v38, %s5462_s16  ;;  %s3834_s16 = sshll.u32 %s7166_s7, 4  ;;  %s7219_s16 = int_to_ptr.vmem [resolvable:$true] %s3834_s16 }
  0x8f   : > { %s5359_s10 = scalar_lea.vmem %s7219_s16, 1536  ;;  %p5366_p0 = scmp.lt.s32.totalorder %s7219_s16, %s5364_s12 }
  0x90   : > { %p5360_p11 = scmp.ne.s32.totalorder %s7219_s16, %s5359_s10  ;;  %p5367_p1 = scmp.lt.s32.totalorder %s5365_s13, %s5359_s10 }
  0x91   : > { %5260 = vrot.lane.b32.xlu0 %v5119_v25, %s5463_s17 }
  0x92   : > { %5265 = vrot.lane.b32.xlu1 %v5124_v26, %s5463_s17  ;;  %p5361_p12 = pnand %p5360_p11, %p5537_p5  ;;  %p5368_p2 = por %p5367_p1, %p5366_p0 }
  0x93   : > { %v5646_v39 = vpop.permute.xlu0 %4980 }
  0x94   : > { %v4991_v40 = vpop.permute.xlu1 %4990  ;;  %v4983_v41 = vunpack.i.h.bf16 %v5646_v39  ;;  %v4982_v42 = vunpack.i.l.bf16 %v5646_v39  ;;  %v5807_v39 = vld [vmem:[%s7325_s1 + $0x70] sm:$0xff]  ;;  %p5362_p13 = pneg %p5361_p12 }
  0x95   : > { %v4992_v43 = vunpack.i.l.bf16 %v4991_v40  ;;  %5270 = vrot.lane.b32.xlu0 %v5129_v27, %s5463_s17  ;;  %v4993_v45 = vunpack.i.h.bf16 %v4991_v40 }
  0x96   : > { %5275 = vrot.lane.b32.xlu1 %v5134_v30, %s5463_s17  ;;  %v321_v49 = vsel %vm319_vm0, %v4982_v42, %v4983_v41  ;;  %p5369_p3 = pnand %p5368_p2, %p5362_p13 }
  0x97   : > { %v5652_v44 = vpop.permute.xlu0 %4985  ;;  %v320_v50 = vsel %vm319_vm0, %v4992_v43, %v4982_v42  ;;  %v5725_v43 = vld [vmem:[%s7325_s1 + $0x58] sm:$0xff] }
  0x98   : > { %v4988_v46 = vunpack.i.h.bf16 %v5652_v44  ;;  %v4987_v47 = vunpack.i.l.bf16 %v5652_v44  ;;  %v5656_v48 = vpop.permute.xlu1 %4995 }
  0x99   : > { %5280 = vrot.lane.b32.xlu0 %v5139_v31, %s5463_s17  ;;  %v4998_v51 = vunpack.i.h.bf16 %v5656_v48  ;;  %v4997_v52 = vunpack.i.l.bf16 %v5656_v48  ;;  %v5708_v31 = vld [vmem:[%s7325_s1 + $0x50] sm:$0xff] }
  0x9a   : > { %v324_v53 = vsel %vm319_vm0, %v4987_v47, %v4988_v46  ;;  %v323_v54 = vsel %vm319_vm0, %v4993_v45, %v4987_v47  ;;  %5285 = vrot.lane.b32.xlu1 %v5144_v32, %s5463_s17 }
  0x9b   : > { %v5670_v55 = vpop.permute.xlu0 %5000  ;;  %v4530_v56 = vpack.c.bf16 %v324_v53, %v321_v49  ;;  %v4532_v57 = vpack.c.bf16 %v323_v54, %v320_v50  ;;  %v327_v63 = vsel %vm319_vm0, %v4997_v52, %v4998_v51 }
  0x9c   : > { %v5003_v58 = vunpack.i.h.bf16 %v5670_v55  ;;  %v5002_v59 = vunpack.i.l.bf16 %v5670_v55  ;;  %v5674_v60 = vpop.permute.xlu1 %5005  ;;  %v5867_v55 = vld [vmem:[%s7325_s1 + $0xc0] sm:$0xff] }
  0x9d   : > { %4531 = vmatprep.subr.bf16.mxu1 %v4530_v56  ;;  %5290 = vrot.lane.b32.xlu0 %v5199_v37, %s5463_s17  ;;  %v7337_v61 = vunpack.i.h.bf16 %v5674_v60  ;;  %v5007_v62 = vunpack.i.l.bf16 %v5674_v60 }
  0x9e   : > { %4533 = vmatpush1.bf16.msra.mxu1 %v4532_v57  ;;  %v330_v2 = vsel %vm319_vm0, %v5002_v59, %v5003_v58  ;;  %5295 = vrot.lane.b32.xlu1 %v5204_v38, %s5463_s17  ;;  %s4918_s17 = smul.u32 144, %s7117_s30 }
  0x9f   : > { %v5686_v3 = vpop.permute.xlu0 %5010  ;;  %v4534_v4 = vpack.c.bf16 %v330_v2, %v327_v63  ;;  %v987_v16 = vsel %vm985_vm1, %v5007_v62, %v7337_v61  ;;  %v5755_v2 = vld [vmem:[%s7325_s1 + $0x60] sm:$0xff] }
  0xa0   : > { %v7336_v7 = vunpack.i.h.bf16 %v5686_v3  ;;  %v5012_v10 = vunpack.i.l.bf16 %v5686_v3  ;;  %v5016_v11 = vpop.permute.xlu1 %5015  ;;  %s7192_s15 = scalar_lea.vmem [#allocation2], %s4918_s17 }
  0xa1   : > { %v5018_v14 = vunpack.i.h.bf16 %v5016_v11  ;;  %v5017_v15 = vunpack.i.l.bf16 %v5016_v11  ;;  %4535 = vmatprep.subr.bf16.mxu1 %v4534_v4  ;;  %v5760_v4 = vld [vmem:[%s7325_s1 + $0xa0] sm:$0xff]  ;;  %s3818_s6 = sshll.u32 %s7192_s15, 4  ;;  %s7272_s6 = int_to_ptr.vmem [resolvable:$true] %s3818_s6 }
  0xa2   : > { %v990_v18 = vsel %vm985_vm1, %v5012_v10, %v7336_v7 }
  0xa3   : > { %v5021_v19 = vpop.permute.xlu0 %5020  ;;  %v326_v20 = vsel %vm319_vm0, %v5017_v15, %v4997_v52  ;;  %v329_v21 = vsel %vm319_vm0, %v5018_v14, %v5002_v59  ;;  %v5698_v22 = vpack.c.bf16 %v990_v18, %v987_v16 }
  0xa4   : > { %v5023_v23 = vunpack.i.h.bf16 %v5021_v19  ;;  %v5022_v24 = vunpack.i.l.bf16 %v5021_v19  ;;  %v5700_v25 = vpop.permute.xlu1 %5025  ;;  %v4536_v26 = vpack.c.bf16 %v329_v21, %v326_v20 }
  0xa5   : > { %4563 = vmatprep.subr.bf16.mxu0 %v5698_v22  ;;  %v7335_v27 = vunpack.i.h.bf16 %v5700_v25  ;;  %v5027_v30 = vunpack.i.l.bf16 %v5700_v25 }
  0xa6   : > { %4537 = vmatpush1.bf16.msra.mxu1 %v4536_v26  ;;  %v986_v32 = vsel %vm985_vm1, %v5022_v24, %v5007_v62  ;;  %v989_v33 = vsel %vm985_vm1, %v5023_v23, %v5012_v10  ;;  %v5778_v26 = vld [vmem:[%s7325_s1 + $0x68] sm:$0xff] }
  0xa7   : > { %v5712_v34 = vpop.permute.xlu0 %5030  ;;  %v5714_v35 = vpack.c.bf16 %v989_v33, %v986_v32  ;;  %v993_v45 = vsel %vm985_vm1, %v5027_v30, %v7335_v27 }
  0xa8   : > { %v7334_v36 = vunpack.i.h.bf16 %v5712_v34  ;;  %v5032_v37 = vunpack.i.l.bf16 %v5712_v34  ;;  %v5036_v38 = vpop.permute.xlu1 %5035 }
  0xa9   : > { %v5038_v40 = vunpack.i.h.bf16 %v5036_v38  ;;  %v5037_v42 = vunpack.i.l.bf16 %v5036_v38  ;;  %3943 = vmatmul.mubr.msk.f32.vlgmr.msra.gmra.mrb[0].mxu1 %vm344_vm2, %v5708_v31  ;;  %4565 = vmatpush1.bf16.msra.mxu0 %v5714_v35 }
  0xaa   : > { %445 = vmatprep.mubr.f32.mxu1 %v7340_v17  ;;  %v996_v47 = vsel %vm985_vm1, %v5032_v37, %v7334_v36 }
  0xab   : > { %v5733_v49 = vpop.permute.xlu0 %5040  ;;  %v5735_v50 = vpack.c.bf16 %v996_v47, %v993_v45  ;;  %v992_v52 = vsel %vm985_vm1, %v5037_v42, %v5027_v30  ;;  %v995_v53 = vsel %vm985_vm1, %v5038_v40, %v5032_v37  ;;  %v5783_v30 = vld [vmem:[%s7325_s1 + $0xa8] sm:$0xff] }
  0xac   : > { %v7333_v54 = vunpack.i.h.bf16 %v5733_v49  ;;  %v5042_v56 = vunpack.i.l.bf16 %v5733_v49  ;;  %v5741_v57 = vpop.permute.xlu1 %5045  ;;  %v5743_v59 = vpack.c.bf16 %v995_v53, %v992_v52 }
  0xad   : > { %v7332_v62 = vunpack.i.h.bf16 %v5741_v57  ;;  %v5047_v63 = vunpack.i.l.bf16 %v5741_v57  ;;  %3944 = vmatmul.mubr.msk.f32.gmra.mrb[2].mxu1 %vm344_vm2, %v5725_v43  ;;  %4567 = vmatprep.subr.bf16.mxu0 %v5735_v50 }
  0xae   : > { %4569 = vmatpush1.bf16.msra.mxu0 %v5743_v59  ;;  %451 = vmatprep.mubr.f32.mxu1 %v7340_v17  ;;  %v1355_v10 = vsel %vm1353_vm3, %v5042_v56, %v7333_v54 }
  0xaf   : > { %v5051_v11 = vpop.permute.xlu0 %5050  ;;  %v1358_v14 = vsel %vm1353_vm3, %v5047_v63, %v7332_v62 }
  0xb0   : > { %v5053_v15 = vunpack.i.h.bf16 %v5051_v11  ;;  %v5052_v16 = vunpack.i.l.bf16 %v5051_v11  ;;  %v5056_v18 = vpop.permute.xlu1 %5055  ;;  %v4578_v19 = vpack.c.bf16 %v1358_v14, %v1355_v10 }
  0xb1   : > { %v5058_v20 = vunpack.i.h.bf16 %v5056_v18  ;;  %v5057_v21 = vunpack.i.l.bf16 %v5056_v18  ;;  %3945 = vmatmul.mubr.msk.f32.gmra.mrb[4].mxu1 %vm344_vm2, %v5755_v2  ;;  %3993 = vmatmul.mubr.msk.f32.vlgmr.msra.gmra.mrb[0].mxu0 %vm344_vm2, %v5760_v4 }
  0xb2   : > { %v1354_v23 = vsel %vm1353_vm3, %v5052_v16, %v5042_v56  ;;  %v1357_v24 = vsel %vm1353_vm3, %v5053_v15, %v5047_v63  ;;  %4579 = vmatprep.subr.bf16.mxu0 %v4578_v19  ;;  %457 = vmatprep.mubr.f32.mxu1 %v7340_v17 }
  0xb3   : > { %v4580_v32 = vpack.c.bf16 %v1357_v24, %v1354_v23  ;;  %v5785_v33 = vpop.permute.xlu0 %5060  ;;  %1110 = vmatprep.mubr.f32.mxu0 %v7340_v17  ;;  %v322_v37 = vsel %vm319_vm0, %v4983_v41, %v5057_v21  ;;  %v325_v38 = vsel %vm319_vm0, %v4988_v46, %v5058_v20  ;;  %v5812_v41 = vld [vmem:[%s7325_s1 + $0xb0] sm:$0xff]  ;;  %v5832_v20 = vld [vmem:[%s7325_s1 + $0x78] sm:$0xff] }
  0xb4   : > { %v7331_v40 = vunpack.i.h.bf16 %v5785_v33  ;;  %v5062_v42 = vunpack.i.l.bf16 %v5785_v33  ;;  %v5796_v45 = vpop.permute.xlu1 %5065  ;;  %v4538_v47 = vpack.c.bf16 %v325_v38, %v322_v37  ;;  %v5838_v21 = vld [vmem:[%s7325_s1 + $0xb8] sm:$0xff] }
  0xb5   : > { %v7330_v52 = vunpack.i.h.bf16 %v5796_v45  ;;  %v5067_v53 = vunpack.i.l.bf16 %v5796_v45  ;;  %3946 = vmatmul.mubr.msk.f32.gmra.mrb[6].mxu1 %vm344_vm2, %v5778_v26  ;;  %3994 = vmatmul.mubr.msk.f32.gmra.mrb[2].mxu0 %vm344_vm2, %v5783_v30 }
  0xb6   : > { %4539 = vmatprep.subr.bf16.mxu1 %v4538_v47  ;;  %4581 = vmatpush1.bf16.msra.mxu0 %v4580_v32  ;;  %v1361_v44 = vsel %vm1353_vm3, %v5062_v42, %v7331_v40 }
  0xb7   : > { %4541 = vmatpush3.bf16.msra.mxu1 %v4538_v47  ;;  %v5071_v46 = vpop.permute.xlu0 %5070  ;;  %463 = vmatprep.mubr.f32.mxu1 %v7340_v17  ;;  %v1364_v56 = vsel %vm1353_vm3, %v5067_v53, %v7330_v52 }
  0xb8   : > { %v5073_v63 = vunpack.i.h.bf16 %v5071_v46  ;;  %v5072_v10 = vunpack.i.l.bf16 %v5071_v46  ;;  %v5076_v11 = vpop.permute.xlu1 %5075  ;;  %1116 = vmatprep.mubr.f32.mxu0 %v7340_v17  ;;  %v4582_v14 = vpack.c.bf16 %v1364_v56, %v1361_v44 }
  0xb9   : > { %v5078_v15 = vunpack.i.h.bf16 %v5076_v11  ;;  %v5077_v16 = vunpack.i.l.bf16 %v5076_v11  ;;  %3947 = vmatmul.mubr.msk.f32.gmra.mrb[8].mxu1 %vm344_vm2, %v5807_v39  ;;  %3995 = vmatmul.mubr.msk.f32.gmra.mrb[4].mxu0 %vm344_vm2, %v5812_v41  ;;  %v5886_v11 = vld [vmem:[%s7325_s1 + $0x88] sm:$0xff] }
  0xba   : > { %v1360_v18 = vsel %vm1353_vm3, %v5072_v10, %v5062_v42  ;;  %v1363_v19 = vsel %vm1353_vm3, %v5073_v63, %v5067_v53  ;;  %469 = vmatprep.mubr.f32.mxu1 %v7340_v17  ;;  %1122 = vmatprep.mubr.f32.mxu0 %v7340_v17 }
  0xbb   : > { %v5840_v23 = vpop.permute.xlu0 %5080  ;;  %v328_v24 = vsel %vm319_vm0, %v4998_v51, %v5077_v16  ;;  %v331_v32 = vsel %vm319_vm0, %v5003_v58, %v5078_v15  ;;  %4583 = vmatprep.subr.bf16.mxu0 %v4582_v14  ;;  %v4584_v37 = vpack.c.bf16 %v1363_v19, %v1360_v18  ;;  %v5862_v51 = vld [vmem:[%s7325_s1 + $0x80] sm:$0xff]  ;;  %v5892_v14 = vld [vmem:[%s7325_s1 + $0xc8] sm:$0xff]  ;;  %v5907_v18 = vld [vmem:[%s7325_s1 + $0x90] sm:$0xff] }
  0xbc   : > { %v5083_v38 = vunpack.i.h.bf16 %v5840_v23  ;;  %v5082_v42 = vunpack.i.l.bf16 %v5840_v23  ;;  %v5850_v47 = vpop.permute.xlu1 %5085  ;;  %v4542_v53 = vpack.c.bf16 %v331_v32, %v328_v24  ;;  %v7353_v23 = vpack.c.bf16 %v5565_v5, %v5555_v0  ;;  %v6022_v0 = vld [vmem:[%s7325_s1 + $0x100] sm:$0xff] }
  0xbd   : > { %v5088_v44 = vunpack.i.h.bf16 %v5850_v47  ;;  %v5087_v48 = vunpack.i.l.bf16 %v5850_v47  ;;  %3948 = vmatmul.mubr.msk.f32.gmra.mrb[10].mxu1 %vm344_vm2, %v5832_v20  ;;  %3996 = vmatmul.mubr.msk.f32.gmra.mrb[6].mxu0 %vm344_vm2, %v5838_v21 }
  0xbe   : > { %4543 = vmatprep.subr.bf16.mxu1 %v4542_v53  ;;  %475 = vmatprep.mubr.f32.mxu1 %v7340_v17  ;;  %v649_v58 = vsel %vm647_vm4, %v5082_v42, %v5083_v38 }
  0xbf   : > { %4545 = vmatpush3.bf16.msra.mxu1 %v4542_v53  ;;  %v5091_v46 = vpop.permute.xlu0 %5090  ;;  %1128 = vmatprep.mubr.f32.mxu0 %v7340_v17  ;;  %v652_v56 = vsel %vm647_vm4, %v5087_v48, %v5088_v44 }
  0xc0   : > { %v5876_v63 = vpop.permute.xlu1 %5095  ;;  %4585 = vmatpush1.bf16.msra.mxu0 %v4584_v37  ;;  %v4546_v10 = vpack.c.bf16 %v652_v56, %v649_v58  ;;  %v5093_v6 = vunpack.i.h.bf16 %v5091_v46  ;;  %v5935_v56 = vld [vmem:[%s7325_s1 + $0xd8] sm:$0xff] }
  0xc1   : > { %3949 = vmatmul.mubr.msk.f32.gmra.mrb[12].mxu1 %vm344_vm2, %v5862_v51  ;;  %3997 = vmatmul.mubr.msk.f32.gmra.mrb[8].mxu0 %vm344_vm2, %v5867_v55  ;;  %v7339_v19 = vunpack.i.h.bf16 %v5876_v63  ;;  %v5097_v24 = vunpack.i.l.bf16 %v5876_v63 }
  0xc2   : > { %481 = vmatprep.mubr.f32.mxu1 %v7340_v17  ;;  %1134 = vmatprep.mubr.f32.mxu0 %v7340_v17  ;;  %v651_v52 = vsel %vm647_vm4, %v5093_v6, %v5087_v48 }
  0xc3   : > { %v5894_v15 = vpop.permute.xlu0 %5100  ;;  %4547 = vmatprep.subr.bf16.mxu1 %v4546_v10  ;;  %4595 = vmatprep.subr.bf16.mxu0 %v4594_v28  ;;  %v5092_v28 = vunpack.i.l.bf16 %v5091_v46  ;;  %v5929_v46 = vld [vmem:[%s7325_s1 + $0x98] sm:$0xff]  ;;  %v655_v54 = vsel %vm647_vm4, %v5097_v24, %v7339_v19  ;;  %v4598_v19 = vpack.c.bf16 %v5586_v13, %v5574_v9 }
  0xc4   : > { %v5106_v16 = vpop.permute.xlu1 %5105  ;;  %v7338_v37 = vunpack.i.h.bf16 %v5894_v15  ;;  %v5102_v53 = vunpack.i.l.bf16 %v5894_v15 }
  0xc5   : > { %3950 = vmatmul.mubr.msk.f32.gmra.mrb[14].mxu1 %vm344_vm2, %v5886_v11  ;;  %3998 = vmatmul.mubr.msk.f32.gmra.mrb[10].mxu0 %vm344_vm2, %v5892_v14  ;;  %v648_v10 = vsel %vm647_vm4, %v5092_v28, %v5082_v42  ;;  %v5108_v40 = vunpack.i.h.bf16 %v5106_v16  ;;  %v5107_v36 = vunpack.i.l.bf16 %v5106_v16  ;;  %v5963_v16 = vld [vmem:[%s7325_s1 + $0xf0] sm:$0xff] }
  0xc6   : > { %487 = vmatprep.mubr.f32.mxu1 %v7340_v17  ;;  %1140 = vmatprep.mubr.f32.mxu0 %v7340_v17  ;;  %v658_v29 = vsel %vm647_vm4, %v5102_v53, %v7338_v37 }
  0xc7   : > { %v5111_v32 = vpop.permute.xlu0 %5110  ;;  %v657_v28 = vsel %vm647_vm4, %v5108_v40, %v5102_v53  ;;  %v654_v6 = vsel %vm647_vm4, %v5107_v36, %v5097_v24  ;;  %v7354_v24 = vunpack.i.h.bf16 %v5674_v60 }
  0xc8   : > { %v5919_v58 = vpop.permute.xlu1 %5115  ;;  %v5113_v27 = vunpack.i.h.bf16 %v5111_v32  ;;  %v5112_v7 = vunpack.i.l.bf16 %v5111_v32  ;;  %v4548_v32 = vpack.c.bf16 %v651_v52, %v648_v10  ;;  %v4552_v40 = vpack.c.bf16 %v657_v28, %v654_v6 }
  0xc9   : > { %3951 = vmatmul.mubr.msk.f32.gmra.mrb[16].mxu1 %vm344_vm2, %v5907_v18  ;;  %3999 = vmatmul.mubr.msk.f32.gmra.mrb[12].mxu0 %vm344_vm2, %v5913_v1  ;;  %v7355_v10 = vunpack.i.h.bf16 %v5686_v3 }
  0xca   : > { %493 = vmatprep.mubr.f32.mxu1 %v7340_v17  ;;  %1146 = vmatprep.mubr.f32.mxu0 %v7340_v17  ;;  %v653_v9 = vsel %vm647_vm4, %v5088_v44, %v5113_v27  ;;  %v5999_v27 = vld [vmem:[%s7325_s1 + $0xf8] sm:$0xff] }
  0xcb   : > { %v5939_v62 = vpop.permute.xlu0 %5120 }
  0xcc   : > { %v5944_v61 = vpop.permute.xlu1 %5125  ;;  %v5123_v42 = vunpack.i.h.bf16 %v5939_v62  ;;  %v7349_v13 = vunpack.i.l.bf16 %v5939_v62 }
  0xcd   : > { %3952 = vmatmul.mubr.msk.f32.gmra.mrb[18].mxu1 %vm344_vm2, %v5929_v46  ;;  %4000 = vmatmul.mubr.msk.f32.gmra.mrb[14].mxu0 %vm344_vm2, %v5935_v56  ;;  %v7350_v36 = vunpack.i.h.bf16 %v5944_v61 }
  0xce   : > { %4331 = vmatprep.mubr.msk.f32.mxu1 %vm344_vm2, %v5708_v31  ;;  %1472 = vmatprep.mubr.f32.mxu0 %v7340_v17  ;;  %v4550_v31 = vpack.c.bf16 %v658_v29, %v655_v54  ;;  %v650_v17 = vsel %vm647_vm4, %v5083_v38, %v5112_v7  ;;  %v2066_v29 = vsel %vm2064_vm5, %v7349_v13, %v5123_v42  ;;  %v7351_v7 = vunpack.i.l.bf16 %v5944_v61 }
  0xcf   : > { %v5965_v37 = vpop.permute.xlu0 %5130  ;;  %v4600_v38 = vpack.c.bf16 %v5583_v12, %v5571_v8 }
  0xd0   : > { %v5971_v48 = vpop.permute.xlu1 %5135  ;;  %v2069_v54 = vsel %vm2064_vm5, %v7351_v7, %v7350_v36 }
  0xd1   : > { %4332 = vmatmul.mubr.msk.f32.vlgmr.msra.gmra.mrb[20].mxu1 %vm344_vm2, %v5725_v43  ;;  %4023 = vmatmul.mubr.msk.f32.vlgmr.msra.gmra.mrb[0].mxu0 %vm344_vm2, %v5963_v16  ;;  %v7352_v43 = vmov 0.0   ;;  %v4610_v44 = vpack.c.bf16 %v2069_v54, %v2066_v29  ;;  %v5117_v54 = vunpack.i.l.bf16 %v5919_v58 }
  0xd2   : > { %4334 = vmatprep.mubr.msk.f32.mxu1 %vm344_vm2, %v5755_v2  ;;  %1478 = vmatprep.mubr.f32.mxu0 %v7352_v43  ;;  %v6010_v2 = vpack.c.bf16 %v653_v9, %v650_v17 }
  0xd3   : > { %v6001_v52 = vpop.permute.xlu0 %5140  ;;  %4549 = vmatpush1.bf16.msra.mxu1 %v4548_v32  ;;  %4597 = vmatpush1.bf16.msra.mxu0 %v7353_v23  ;;  %v7359_v23 = vunpack.i.h.bf16 %v5741_v57  ;;  %v6095_v57 = vld [vmem:[%s7325_s1] sm:$0xff] }
  0xd4   : > { %v6008_v47 = vpop.permute.xlu1 %5145  ;;  %4551 = vmatprep.subr.bf16.mxu1 %v4550_v31  ;;  %4599 = vmatprep.subr.bf16.mxu0 %v4598_v19  ;;  %v7357_v31 = vunpack.i.h.bf16 %v5712_v34  ;;  %v6065_v34 = vld [vmem:[%s7325_s1 + $0x110] sm:$0xff] }
  0xd5   : > { %4335 = vmatmul.mubr.msk.f32.gmra.mrb[22].mxu1 %vm344_vm2, %v5778_v26  ;;  %4024 = vmatmul.mubr.msk.f32.gmra.mrb[2].mxu0 %vm344_vm2, %v5999_v27 }
  0xd6   : > { %4337 = vmatprep.mubr.msk.f32.mxu1 %vm344_vm2, %v5807_v39  ;;  %1484 = vmatprep.mubr.f32.mxu0 %v7352_v43  ;;  %v6035_v39 = vld [vmem:[%s7325_s1 + $0x108] sm:$0xff] }
  0xd7   : > { %v5151_v5 = vpop.permute.xlu0 %5150  ;;  %4553 = vmatpush1.bf16.msra.mxu1 %v4552_v40  ;;  %4601 = vmatpush1.bf16.msra.mxu0 %v4600_v38  ;;  %v7358_v40 = vunpack.i.h.bf16 %v5733_v49 }
  0xd8   : > { %v5153_v8 = vunpack.i.h.bf16 %v5151_v5  ;;  %v5152_v12 = vunpack.i.l.bf16 %v5151_v5  ;;  %v5156_v17 = vpop.permute.xlu1 %5155  ;;  %4555 = vmatprep.subr.bf16.mxu1 %v6010_v2  ;;  %4611 = vmatprep.subr.bf16.mxu0 %v4610_v44 }
  0xd9   : > { %v5158_v26 = vunpack.i.h.bf16 %v5156_v17  ;;  %v5157_v19 = vunpack.i.l.bf16 %v5156_v17  ;;  %4338 = vmatmul.mubr.msk.f32.gmra.mrb[24].mxu1 %vm344_vm2, %v5832_v20  ;;  %4025 = vmatmul.mubr.msk.f32.gmra.mrb[4].mxu0 %vm344_vm2, %v6022_v0 }
  0xda   : > { %4340 = vmatprep.mubr.msk.f32.mxu1 %vm344_vm2, %v5862_v51  ;;  %1490 = vmatprep.mubr.f32.mxu0 %v7352_v43  ;;  %v988_v53 = vsel %vm985_vm1, %v7354_v24, %v5152_v12  ;;  %v991_v20 = vsel %vm985_vm1, %v7355_v10, %v5153_v8  ;;  %v7356_v51 = vunpack.i.h.bf16 %v5700_v25  ;;  %v5118_v25 = vunpack.i.h.bf16 %v5919_v58 }
  0xdb   : > { %v5161_v6 = vpop.permute.xlu0 %5160  ;;  %v6043_v28 = vpack.c.bf16 %v991_v20, %v988_v53  ;;  %v997_v9 = vsel %vm985_vm1, %v7357_v31, %v5158_v26  ;;  %v7361_v8 = vunpack.i.h.bf16 %v5796_v45  ;;  %v7363_v26 = vunpack.i.h.bf16 %v5894_v15  ;;  %v6127_v15 = vld [vmem:[%s7325_s1 + $0x120] sm:$0xff] }
  0xdc   : > { %v994_v32 = vsel %vm985_vm1, %v7356_v51, %v5157_v19  ;;  %v5163_v13 = vunpack.i.h.bf16 %v5161_v6  ;;  %v5162_v29 = vunpack.i.l.bf16 %v5161_v6  ;;  %v5166_v60 = vpop.permute.xlu1 %5165  ;;  %v6107_v19 = vld [vmem:[%s7325_s1 + $0x118] sm:$0xff]  ;;  %v6147_v51 = vld [vmem:[%s7325_s1 + $0x128] sm:$0xff]  ;;  %v5143_v31 = vunpack.i.h.bf16 %v6001_v52 }
  0xdd   : > { %v6051_v36 = vpack.c.bf16 %v997_v9, %v994_v32  ;;  %v5168_v7 = vunpack.i.h.bf16 %v5166_v60  ;;  %v5167_v3 = vunpack.i.l.bf16 %v5166_v60  ;;  %4341 = vmatmul.mubr.msk.f32.gmra.mrb[26].mxu1 %vm344_vm2, %v5886_v11  ;;  %4026 = vmatmul.mubr.msk.f32.gmra.mrb[6].mxu0 %vm344_vm2, %v6035_v39  ;;  %v5138_v32 = vunpack.i.h.bf16 %v5971_v48 }
  0xde   : > { %4343 = vmatprep.mubr.msk.f32.mxu1 %vm344_vm2, %v5907_v18  ;;  %1496 = vmatprep.mubr.f32.mxu0 %v7352_v43  ;;  %v1356_v11 = vsel %vm1353_vm3, %v7358_v40, %v5162_v29  ;;  %v1359_v38 = vsel %vm1353_vm3, %v7359_v23, %v5163_v13  ;;  %v7360_v18 = vunpack.i.h.bf16 %v5785_v33  ;;  %v7362_v33 = vunpack.i.h.bf16 %v5876_v63  ;;  %v6122_v63 = vld [vmem:[%s7325_s1 + $0x8] sm:$0xff] }
  0xdf   : > { %v6073_v44 = vpop.permute.xlu0 %5170  ;;  %v6075_v58 = vpack.c.bf16 %v1359_v38, %v1356_v11  ;;  %v1365_v12 = vsel %vm1353_vm3, %v7361_v8, %v5168_v7  ;;  %v7364_v11 = vunpack.i.h.bf16 %v5944_v61  ;;  %v5132_v38 = vunpack.i.l.bf16 %v5965_v37 }
  0xe0   : > { %v1362_v5 = vsel %vm1353_vm3, %v7360_v18, %v5167_v3  ;;  %v6083_v17 = vpop.permute.xlu1 %5175  ;;  %v656_v45 = vsel %vm647_vm4, %v7362_v33, %v5117_v54  ;;  %v6168_v54 = vld [vmem:[%s7325_s1 + $0x130] sm:$0xff]  ;;  %v5137_v33 = vunpack.i.l.bf16 %v5971_v48  ;;  %v6203_v48 = vld [vmem:[%s7325_s1 + $0x138] sm:$0xff] }
  0xe1   : > { %v6085_v49 = vpack.c.bf16 %v1365_v12, %v1362_v5  ;;  %4344 = vmatmul.mubr.msk.f32.gmra.mrb[28].mxu1 %vm344_vm2, %v5929_v46  ;;  %4027 = vmatmul.mubr.msk.f32.gmra.mrb[8].mxu0 %vm344_vm2, %v6065_v34  ;;  %v659_v46 = vsel %vm647_vm4, %v7363_v26, %v5118_v25  ;;  %v5133_v25 = vunpack.i.h.bf16 %v5965_v37  ;;  %v6197_v37 = vld [vmem:[%s7325_s1 + $0x20] sm:$0xff]  ;;  %7366 = vst [vmem:[#allocation9_spill] sm:$0xff] %v6203_v48 }
  0xe2   : > { %766 = vmatprep.mubr.f32.mxu1 %v7352_v43  ;;  %1502 = vmatprep.mubr.f32.mxu0 %v7352_v43  ;;  %v4558_v10 = vpack.c.bf16 %v659_v46, %v656_v45  ;;  %v5142_v45 = vunpack.i.l.bf16 %v6001_v52  ;;  %v7367_v52 = vunpack.i.l.bf16 %v5939_v62  ;;  %v5173_v62 = vunpack.i.h.bf16 %v6073_v44 }
  0xe3   : > { %v6109_v24 = vpop.permute.xlu0 %5180 }
  0xe4   : > { %v6111_v53 = vpop.permute.xlu1 %5185  ;;  %v2065_v46 = vsel %vm2064_vm5, %v5132_v38, %v7367_v52 }
  0xe5   : > { %3963 = vmatmul.mubr.msk.f32.vlgmr.msra.gmra.mrb[0].mxu1 %vm344_vm2, %v6095_v57  ;;  %4028 = vmatmul.mubr.msk.f32.gmra.mrb[10].mxu0 %vm344_vm2, %v6107_v19 }
  0xe6   : > { %4557 = vmatpush3.bf16.msra.mxu1 %v6010_v2  ;;  %772 = vmatprep.mubr.f32.mxu1 %v7352_v43  ;;  %v6142_v2 = vld [vmem:[%s7325_s1 + $0x10] sm:$0xff] }
  0xe7   : > { %4559 = vmatprep.subr.bf16.mxu1 %v4558_v10  ;;  %1508 = vmatprep.mubr.f32.mxu0 %v7352_v43  ;;  %v6130_v20 = vpop.permute.xlu0 %5190 }
  0xe8   : > { %v6132_v6 = vpop.permute.xlu1 %5195 }
  0xe9   : > { %3964 = vmatmul.mubr.msk.f32.gmra.mrb[2].mxu1 %vm344_vm2, %v6122_v63  ;;  %4029 = vmatmul.mubr.msk.f32.gmra.mrb[12].mxu0 %vm344_vm2, %v6127_v15 }
  0xea   : > { %4561 = vmatpush3.bf16.msra.mxu1 %v4558_v10  ;;  %778 = vmatprep.mubr.f32.mxu1 %v7352_v43  ;;  %v7368_v10 = vunpack.i.l.bf16 %v5944_v61  ;;  %v5178_v61 = vunpack.i.h.bf16 %v6083_v17 }
  0xeb   : > { %4674 = vmatprep.subr.bf16.mxu1 %v5698_v22  ;;  %1514 = vmatprep.mubr.f32.mxu0 %v7352_v43  ;;  %v5201_v9 = vpop.permute.xlu0 %5200  ;;  %v6162_v22 = vld [vmem:[%s7325_s1 + $0x18] sm:$0xff] }
  0xec   : > { %v5203_v13 = vunpack.i.h.bf16 %v5201_v9  ;;  %v5202_v29 = vunpack.i.l.bf16 %v5201_v9  ;;  %v5206_v60 = vpop.permute.xlu1 %5205  ;;  %v2068_v9 = vsel %vm2064_vm5, %v5133_v25, %v7368_v10 }
  0xed   : > { %3965 = vmatmul.mubr.msk.f32.gmra.mrb[4].mxu1 %vm344_vm2, %v6142_v2  ;;  %4030 = vmatmul.mubr.msk.f32.gmra.mrb[14].mxu0 %vm344_vm2, %v6147_v51  ;;  %v5208_v7 = vunpack.i.h.bf16 %v5206_v60  ;;  %v5207_v3 = vunpack.i.l.bf16 %v5206_v60  ;;  %v5147_v60 = vunpack.i.l.bf16 %v6008_v47  ;;  %v4612_v25 = vpack.c.bf16 %v2068_v9, %v2065_v46 }
  0xee   : > { %784 = vmatprep.mubr.f32.mxu1 %v7352_v43  ;;  %1520 = vmatprep.mubr.f32.mxu0 %v7352_v43  ;;  %v2067_v40 = vsel %vm2064_vm5, %v5123_v42, %v5202_v29  ;;  %v2070_v23 = vsel %vm2064_vm5, %v7364_v11, %v5203_v13  ;;  %v5148_v29 = vunpack.i.h.bf16 %v6008_v47  ;;  %v7343_v11 = vunpack.i.l.bf16 %v6073_v44 }
  0xef   : > { %v6177_v18 = vpop.permute.xlu0 %5210  ;;  %v6179_v5 = vpack.c.bf16 %v2070_v23, %v2067_v40  ;;  %v2073_v8 = vsel %vm2064_vm5, %v5138_v32, %v5207_v3  ;;  %v2076_v12 = vsel %vm2064_vm5, %v5143_v31, %v5208_v7  ;;  %v2072_v7 = vsel %vm2064_vm5, %v5137_v33, %v5138_v32  ;;  %v6231_v32 = vld [vmem:[%s7325_s1 + $0x28] sm:$0xff] }
  0xf0   : > { %v6185_v26 = vpop.permute.xlu1 %5215  ;;  %v6187_v42 = vpack.c.bf16 %v2076_v12, %v2073_v8  ;;  %v2075_v3 = vsel %vm2064_vm5, %v5142_v45, %v5143_v31  ;;  %v7342_v47 = vunpack.i.l.bf16 %v6083_v17  ;;  %v6237_v31 = vld [vmem:[%s7325_s1 + $0x140] sm:$0xff]  ;;  %v2074_v38 = vsel %vm2064_vm5, %v5148_v29, %v5142_v45  ;;  %v6263_v45 = vld [vmem:[%s7325_s1 + $0x148] sm:$0xff] }
  0xf1   : > { %3966 = vmatmul.mubr.msk.f32.gmra.mrb[6].mxu1 %vm344_vm2, %v6162_v22  ;;  %4031 = vmatmul.mubr.msk.f32.gmra.mrb[16].mxu0 %vm344_vm2, %v6168_v54  ;;  %7369 = vst [vmem:[#allocation10_spill] sm:$0xff] %v6237_v31  ;;  %v2071_v8 = vsel %vm2064_vm5, %v5147_v60, %v5137_v33  ;;  %v4614_v12 = vpack.c.bf16 %v2075_v3, %v2072_v7  ;;  %v256_v33 = vld [vmem:[%s7325_s1 + $0x30] sm:$0xff]  ;;  %v5193_v29 = vunpack.i.h.bf16 %v6130_v20  ;;  %v5188_v60 = vunpack.i.h.bf16 %v6111_v53 }
  0xf2   : > { %7365 = vst [vmem:[#allocation8_spill] sm:$0xff] %v6187_v42  ;;  %790 = vmatprep.mubr.f32.mxu1 %v7352_v43  ;;  %1526 = vmatprep.mubr.f32.mxu0 %v7352_v43  ;;  %v2434_v10 = vsel %vm2432_vm6, %v7343_v11, %v5173_v62  ;;  %v2437_v46 = vsel %vm2432_vm6, %v7342_v47, %v5178_v61 }
  0xf3   : > { %v6211_v13 = vpop.permute.xlu0 %5220  ;;  %v4616_v9 = vpack.c.bf16 %v2074_v38, %v2071_v8  ;;  %v4626_v11 = vpack.c.bf16 %v2437_v46, %v2434_v10  ;;  %v6278_v38 = vld [vmem:[%s7325_s1 + $0x150] sm:$0xff] }
  0xf4   : > { %v6217_v40 = vpop.permute.xlu1 %5225 }
  0xf5   : > { %3967 = vmatmul.mubr.msk.f32.gmra.mrb[8].mxu1 %vm344_vm2, %v6197_v37  ;;  %4032 = vmatmul.mubr.msk.f32.gmra.mrb[18].mxu0 %vm344_vm2, %v6203_v48 }
  0xf6   : > { %796 = vmatprep.mubr.f32.mxu1 %v7352_v43  ;;  %1783 = vmatprep.mubr.f32.mxu0 %v7352_v43 }
  0xf7   : > { %v6239_v23 = vpop.permute.xlu0 %5230 }
  0xf8   : > { %v6243_v52 = vpop.permute.xlu1 %5235 }
  0xf9   : > { %3968 = vmatmul.mubr.msk.f32.gmra.mrb[10].mxu1 %vm344_vm2, %v6231_v32  ;;  %4053 = vmatmul.mubr.msk.f32.vlgmr.msra.gmra.mrb[0].mxu0 %vm344_vm2, %v6237_v31 }
  0xfa   : > { %802 = vmatprep.mubr.f32.mxu1 %v7352_v43  ;;  %1789 = vmatprep.mubr.f32.mxu0 %v7352_v43 }
  0xfb   : > { %4613 = vmatpush1.bf16.msra.mxu0 %v4612_v25  ;;  %v5241_v7 = vpop.permute.xlu0 %5240  ;;  %v257_v25 = vld [vmem:[%s7325_s1 + $0x38] sm:$0xff] }
  0xfc   : > { %4615 = vmatprep.subr.bf16.mxu0 %v4614_v12  ;;  %v5243_v3 = vunpack.i.h.bf16 %v5241_v7  ;;  %v5242_v47 = vunpack.i.l.bf16 %v5241_v7  ;;  %v5246_v42 = vpop.permute.xlu1 %5245 }
  0xfd   : > { %3969 = vmatmul.mubr.msk.f32.gmra.mrb[12].mxu1 %vm344_vm2, %v256_v33  ;;  %4054 = vmatmul.mubr.msk.f32.gmra.mrb[2].mxu0 %vm344_vm2, %v6263_v45  ;;  %v5248_v31 = vunpack.i.h.bf16 %v5246_v42  ;;  %v5247_v48 = vunpack.i.l.bf16 %v5246_v42 }
  0xfe   : > { %808 = vmatprep.mubr.f32.mxu1 %v7352_v43  ;;  %1795 = vmatprep.mubr.f32.mxu0 %v7352_v43  ;;  %v2435_v8 = vsel %vm2432_vm6, %v5173_v62, %v5242_v47  ;;  %v2438_v12 = vsel %vm2432_vm6, %v5178_v61, %v5243_v3  ;;  %v258_v62 = vld [vmem:[%s7325_s1 + $0x40] sm:$0xff]  ;;  %v6327_v47 = vld [vmem:[%s7325_s1 + $0x168] sm:$0xff]  ;;  %v5198_v3 = vunpack.i.h.bf16 %v6132_v6 }
  0xff   : > { %4617 = vmatpush1.bf16.msra.mxu0 %v4616_v9  ;;  %v6282_v10 = vpack.c.bf16 %v2438_v12, %v2435_v8  ;;  %v2441_v42 = vsel %vm2432_vm6, %v5188_v60, %v5247_v48  ;;  %v2444_v46 = vsel %vm2432_vm6, %v5193_v29, %v5248_v31  ;;  %v6303_v48 = vld [vmem:[%s7325_s1 + $0x158] sm:$0xff]  ;;  %v6316_v61 = vld [vmem:[%s7325_s1 + $0x160] sm:$0xff] }
 0x100   : > { %4627 = vmatprep.subr.bf16.mxu0 %v4626_v11  ;;  %v6290_v7 = vpack.c.bf16 %v2444_v46, %v2441_v42  ;;  %v259_v11 = vld [vmem:[%s7325_s1 + $0x48] sm:$0xff]  ;;  %v6423_v42 = vld [vmem:[%s7325_s1 + $0x198] sm:$0xff]  ;;  %v5218_v46 = vunpack.i.h.bf16 %v6185_v26 }
 0x101   : > { %3970 = vmatmul.mubr.msk.f32.gmra.mrb[14].mxu1 %vm344_vm2, %v257_v25  ;;  %4055 = vmatmul.mubr.msk.f32.gmra.mrb[4].mxu0 %vm344_vm2, %v6278_v38 }
 0x102   : > { %814 = vmatprep.mubr.f32.mxu1 %v7352_v43  ;;  %1801 = vmatprep.mubr.f32.mxu0 %v7352_v43 }
 0x105   : > { %3971 = vmatmul.mubr.msk.f32.gmra.mrb[16].mxu1 %vm344_vm2, %v258_v62  ;;  %4056 = vmatmul.mubr.msk.f32.gmra.mrb[6].mxu0 %vm344_vm2, %v6303_v48 }
 0x106   : > { %820 = vmatprep.mubr.f32.mxu1 %v7352_v43  ;;  %1807 = vmatprep.mubr.f32.mxu0 %v7352_v43 }
 0x109   : > { %3972 = vmatmul.mubr.msk.f32.gmra.mrb[18].mxu1 %vm344_vm2, %v259_v11  ;;  %4057 = vmatmul.mubr.msk.f32.gmra.mrb[8].mxu0 %vm344_vm2, %v6316_v61 }
 0x10a   : > { %4354 = vmatprep.mubr.msk.f32.mxu1 %vm344_vm2, %v6095_v57  ;;  %1813 = vmatprep.mubr.f32.mxu0 %v7352_v43  ;;  %v6339_v57 = vld [vmem:[%s7325_s1 + $0x170] sm:$0xff] }
 0x10d   : > { %4355 = vmatmul.mubr.msk.f32.vlgmr.msra.gmra.mrb[20].mxu1 %vm344_vm2, %v6122_v63  ;;  %4058 = vmatmul.mubr.msk.f32.gmra.mrb[10].mxu0 %vm344_vm2, %v6327_v47  ;;  %v5182_v63 = vunpack.i.l.bf16 %v6109_v24 }
 0x10e   : > { %4676 = vmatpush1.bf16.msra.mxu1 %v5714_v35  ;;  %4357 = vmatprep.mubr.msk.f32.mxu1 %vm344_vm2, %v6142_v2  ;;  %v6353_v35 = vld [vmem:[%s7325_s1 + $0x178] sm:$0xff]  ;;  %v6378_v2 = vld [vmem:[%s7325_s1 + $0x188] sm:$0xff] }
 0x10f   : > { %4675 = vmatprep.subr.bf16.mxu1 %v5735_v50  ;;  %1819 = vmatprep.mubr.f32.mxu0 %v7352_v43  ;;  %v6366_v50 = vld [vmem:[%s7325_s1 + $0x180] sm:$0xff] }
 0x111   : > { %4358 = vmatmul.mubr.msk.f32.gmra.mrb[22].mxu1 %vm344_vm2, %v6162_v22  ;;  %4059 = vmatmul.mubr.msk.f32.gmra.mrb[12].mxu0 %vm344_vm2, %v6339_v57  ;;  %v7370_v22 = vunpack.i.l.bf16 %v6073_v44  ;;  %v6395_v44 = vld [vmem:[%s7325_s1 + $0xe0] sm:$0xff] }
 0x112   : > { %4677 = vmatpush1.bf16.msra.mxu1 %v5743_v59  ;;  %4360 = vmatprep.mubr.msk.f32.mxu1 %vm344_vm2, %v6197_v37  ;;  %v5183_v59 = vunpack.i.h.bf16 %v6109_v24  ;;  %v5192_v24 = vunpack.i.l.bf16 %v6130_v20 }
 0x113   : > { %4571 = vmatprep.subr.bf16.mxu1 %v6043_v28  ;;  %1825 = vmatprep.mubr.f32.mxu0 %v7352_v43  ;;  %v2433_v37 = vsel %vm2432_vm6, %v5182_v63, %v7370_v22  ;;  %v5355_v63 = vld [vmem:[%s5552_s9 + $0x18] sm:$0xff]  ;;  %v5356_v22 = vld [vmem:[%s5552_s9 + $0x40] sm:$0xff] }
 0x114   : > { %v2443_v12 = vsel %vm2432_vm6, %v5192_v24, %v5193_v29  ;;  %v5213_v29 = vunpack.i.h.bf16 %v6177_v18 }
 0x115   : > { %4361 = vmatmul.mubr.msk.f32.gmra.mrb[24].mxu1 %vm344_vm2, %v6231_v32  ;;  %4060 = vmatmul.mubr.msk.f32.gmra.mrb[14].mxu0 %vm344_vm2, %v6353_v35  ;;  %v7371_v32 = vunpack.i.l.bf16 %v6083_v17  ;;  %v6401_v17 = vld [vmem:[%s7325_s1 + $0x190] sm:$0xff] }
 0x116   : > { %4363 = vmatprep.mubr.msk.f32.mxu1 %vm344_vm2, %v256_v33  ;;  %1831 = vmatprep.mubr.f32.mxu0 %v7352_v43  ;;  %v5187_v33 = vunpack.i.l.bf16 %v6111_v53  ;;  %v2442_v53 = vsel %vm2432_vm6, %v5198_v3, %v5192_v24 }
 0x117   : > { %v2436_v31 = vsel %vm2432_vm6, %v5183_v59, %v7371_v32  ;;  %v5222_v32 = vunpack.i.l.bf16 %v6211_v13 }
 0x118   : > { %v4628_v9 = vpack.c.bf16 %v2436_v31, %v2433_v37  ;;  %v2440_v8 = vsel %vm2432_vm6, %v5187_v33, %v5188_v60  ;;  %v5212_v60 = vunpack.i.l.bf16 %v6177_v18  ;;  %v4602_v37 = vpack.c.bf16 %v5356_v22, %v5355_v63 }
 0x119   : > { %4364 = vmatmul.mubr.msk.f32.gmra.mrb[26].mxu1 %vm344_vm2, %v257_v25  ;;  %4061 = vmatmul.mubr.msk.f32.gmra.mrb[16].mxu0 %vm344_vm2, %v6366_v50  ;;  %v5197_v25 = vunpack.i.l.bf16 %v6132_v6  ;;  %v3992_v6 = vld [vmem:[%s7325_s1 + $0xe8] sm:$0xff]  ;;  %v5232_v31 = vunpack.i.l.bf16 %v6239_v23 }
 0x11a   : > { %4366 = vmatprep.mubr.msk.f32.mxu1 %vm344_vm2, %v258_v62  ;;  %1837 = vmatprep.mubr.f32.mxu0 %v7352_v43  ;;  %v5217_v62 = vunpack.i.l.bf16 %v6185_v26  ;;  %v2801_v3 = vsel %vm2800_vm7, %v5222_v32, %v5212_v60 }
 0x11b   : > { %v2439_v20 = vsel %vm2432_vm6, %v5197_v25, %v5187_v33  ;;  %v5228_v33 = vunpack.i.h.bf16 %v6217_v40  ;;  %v5238_v25 = vunpack.i.h.bf16 %v6243_v52 }
 0x11c   : > { %v4632_v59 = vpack.c.bf16 %v2442_v53, %v2439_v20 }
 0x11d   : > { %4367 = vmatmul.mubr.msk.f32.gmra.mrb[28].mxu1 %vm344_vm2, %v259_v11  ;;  %4062 = vmatmul.mubr.msk.f32.gmra.mrb[18].mxu0 %vm344_vm2, %v6378_v2  ;;  %v6442_v11 = vld [vmem:[%s7325_s1 + $0x1a0] sm:$0xff] }
 0x11e   : > { %1152 = vmatprep.mubr.f32.mxu1 %v7352_v43  ;;  %2183 = vmatprep.mubr.f32.mxu0 %v7352_v43 }
 0x121   : > { %4001 = vmatmul.mubr.msk.f32.vlgmr.msra.gmra.mrb[16].mxu1 %vm344_vm2, %v6395_v44  ;;  %4083 = vmatmul.mubr.msk.f32.vlgmr.msra.gmra.mrb[0].mxu0 %vm344_vm2, %v6401_v17 }
 0x122   : > { %4573 = vmatpush3.bf16.msra.mxu1 %v6043_v28  ;;  %1158 = vmatprep.mubr.f32.mxu1 %v7352_v43  ;;  %v4630_v28 = vpack.c.bf16 %v2443_v12, %v2440_v8 }
 0x123   : > { %4575 = vmatprep.subr.bf16.mxu1 %v6051_v36  ;;  %2189 = vmatprep.mubr.f32.mxu0 %v7352_v43 }
 0x124   : > { %4629 = vmatpush1.bf16.msra.mxu0 %v4628_v9  ;;  %v6542_v9 = vpop.permute.xlu1 %5255 }
 0x125   : > { %4002 = vmatmul.mubr.msk.f32.gmra.mrb[18].mxu1 %vm344_vm2, %v3992_v6  ;;  %4084 = vmatmul.mubr.msk.f32.gmra.mrb[2].mxu0 %vm344_vm2, %v6423_v42 }
 0x126   : > { %4577 = vmatpush3.bf16.msra.mxu1 %v6051_v36  ;;  %4377 = vmatprep.mubr.msk.f32.mxu1 %vm344_vm2, %v5760_v4  ;;  %v2802_v4 = vsel %vm2800_vm7, %v5212_v60, %v5213_v29  ;;  %v2805_v36 = vsel %vm2800_vm7, %v5217_v62, %v5218_v46 }
 0x127   : > { %4587 = vmatprep.subr.bf16.mxu1 %v6075_v58  ;;  %2195 = vmatprep.mubr.f32.mxu0 %v7352_v43  ;;  %v4642_v24 = vpack.c.bf16 %v2805_v36, %v2802_v4 }
 0x128   : > { %4631 = vmatprep.subr.bf16.mxu0 %v4630_v28  ;;  %v6573_v53 = vpop.permute.xlu1 %5265 }
 0x129   : > { %4378 = vmatmul.mubr.msk.f32.vlgmr.msra.gmra.mrb[20].mxu1 %vm344_vm2, %v5783_v30  ;;  %4085 = vmatmul.mubr.msk.f32.gmra.mrb[4].mxu0 %vm344_vm2, %v6442_v11  ;;  %v6466_v30 = vld [vmem:[%s7325_s1 + $0x1a8] sm:$0xff]  ;;  %v5268_v28 = vunpack.i.h.bf16 %v6573_v53  ;;  %v5267_v60 = vunpack.i.l.bf16 %v6573_v53 }
 0x12a   : > { %4589 = vmatpush3.bf16.msra.mxu1 %v6075_v58  ;;  %4380 = vmatprep.mubr.msk.f32.mxu1 %vm344_vm2, %v5812_v41  ;;  %v6482_v41 = vld [vmem:[%s7325_s1 + $0x1b0] sm:$0xff] }
 0x12b   : > { %4591 = vmatprep.subr.bf16.mxu1 %v6085_v49  ;;  %2201 = vmatprep.mubr.f32.mxu0 %v7352_v43  ;;  %v3173_v63 = vsel %vm3168_vm8, %v5267_v60, %v5268_v28 }
 0x12c   : > { %4633 = vmatpush1.bf16.msra.mxu0 %v4632_v59  ;;  %v2810_v59 = vsel %vm2800_vm7, %v5238_v25, %v5232_v31  ;;  %v6709_v32 = vpop.permute.xlu1 %5275 }
 0x12d   : > { %4381 = vmatmul.mubr.msk.f32.gmra.mrb[22].mxu1 %vm344_vm2, %v5838_v21  ;;  %4086 = vmatmul.mubr.msk.f32.gmra.mrb[6].mxu0 %vm344_vm2, %v6466_v30  ;;  %v6495_v21 = vld [vmem:[%s7325_s1 + $0x1b8] sm:$0xff] }
 0x12e   : > { %4593 = vmatpush3.bf16.msra.mxu1 %v6085_v49  ;;  %4383 = vmatprep.mubr.msk.f32.mxu1 %vm344_vm2, %v5867_v55  ;;  %v6507_v55 = vld [vmem:[%s7325_s1 + $0x1c0] sm:$0xff]  ;;  %v5223_v49 = vunpack.i.h.bf16 %v6211_v13  ;;  %v6553_v13 = vld [vmem:[%s7325_s1 + $0x1d8] sm:$0xff] }
 0x12f   : > { %2207 = vmatprep.mubr.f32.mxu0 %v7352_v43  ;;  %4603 = vmatprep.subr.bf16.mxu1 %v4602_v37 }
 0x130   : > { %4643 = vmatprep.subr.bf16.mxu0 %v4642_v24  ;;  %v7372_v24 = vld [vmem:[#allocation9_spill] sm:$0xff] }
 0x131   : > { %4384 = vmatmul.mubr.msk.f32.gmra.mrb[24].mxu1 %vm344_vm2, %v5892_v14  ;;  %4087 = vmatmul.mubr.msk.f32.gmra.mrb[8].mxu0 %vm344_vm2, %v6482_v41  ;;  %v6518_v14 = vld [vmem:[%s7325_s1 + $0x1c8] sm:$0xff] }
 0x132   : > { %4386 = vmatprep.mubr.msk.f32.mxu1 %vm344_vm2, %v5913_v1  ;;  %2213 = vmatprep.mubr.f32.mxu0 %v7352_v43  ;;  %v5357_v1 = vld [vmem:[%s5552_s9 + $0x68] sm:$0xff] }
 0x135   : > { %4387 = vmatmul.mubr.msk.f32.gmra.mrb[26].mxu1 %vm344_vm2, %v5935_v56  ;;  %4088 = vmatmul.mubr.msk.f32.gmra.mrb[10].mxu0 %vm344_vm2, %v6495_v21  ;;  %v5358_v56 = vld [vmem:[%s5552_s9 + $0x90] sm:$0xff]  ;;  %s4922_s9 = smul.u32 1536, %s5520_s22 }
 0x136   : > { %4389 = vmatprep.mubr.msk.f32.mxu1 %vm344_vm2, %v6395_v44  ;;  %2219 = vmatprep.mubr.f32.mxu0 %v7352_v43  ;;  %v4606_v58 = vpack.c.bf16 %v5358_v56, %v5357_v1  ;;  %v6540_v44 = vpop.permute.xlu0 %5250  ;;  %v7373_v1 = vld [vmem:[#allocation10_spill] sm:$0xff]  ;;  %v6637_v56 = vld [vmem:[%s7325_s1 + $0x1f8] sm:$0xff] }
 0x137   : > { %s7217_s25 = scalar_lea.hbm %s7329_s5, %s4922_s9 }
 0x139   : > { %4390 = vmatmul.mubr.msk.f32.gmra.mrb[28].mxu1 %vm344_vm2, %v3992_v6  ;;  %4089 = vmatmul.mubr.msk.f32.gmra.mrb[12].mxu0 %vm344_vm2, %v6507_v55 }
 0x13a   : > { %4400 = vmatprep.mubr.msk.f32.mxu1 %vm344_vm2, %v5963_v16  ;;  %2225 = vmatprep.mubr.f32.mxu0 %v7352_v43  ;;  %v6531_v16 = vld [vmem:[%s7325_s1 + $0x1d0] sm:$0xff]  ;;  %v6571_v6 = vpop.permute.xlu0 %5260 }
 0x13b   : > { %v5262_v20 = vunpack.i.l.bf16 %v6571_v6 }
 0x13d   : > { %4401 = vmatmul.mubr.msk.f32.vlgmr.msra.gmra.mrb[20].mxu1 %vm344_vm2, %v5999_v27  ;;  %4090 = vmatmul.mubr.msk.f32.gmra.mrb[14].mxu0 %vm344_vm2, %v6518_v14  ;;  %v5233_v27 = vunpack.i.h.bf16 %v6239_v23 }
 0x13e   : > { %4605 = vmatpush3.bf16.msra.mxu1 %v4602_v37  ;;  %4403 = vmatprep.mubr.msk.f32.mxu1 %vm344_vm2, %v6022_v0  ;;  %v5227_v0 = vunpack.i.l.bf16 %v6217_v40 }
 0x13f   : > { %4607 = vmatprep.subr.bf16.mxu1 %v4606_v58  ;;  %2231 = vmatprep.mubr.f32.mxu0 %v7352_v43  ;;  %v2811_v12 = vsel %vm2800_vm7, %v5232_v31, %v5233_v27  ;;  %v5278_v31 = vunpack.i.h.bf16 %v6709_v32 }
 0x140   : > { %v2808_v8 = vsel %vm2800_vm7, %v5227_v0, %v5228_v33 }
 0x141   : > { %4404 = vmatmul.mubr.msk.f32.gmra.mrb[22].mxu1 %vm344_vm2, %v6035_v39  ;;  %4091 = vmatmul.mubr.msk.f32.gmra.mrb[16].mxu0 %vm344_vm2, %v6531_v16  ;;  %v2804_v39 = vsel %vm2800_vm7, %v5223_v49, %v5217_v62  ;;  %v4646_v36 = vpack.c.bf16 %v2811_v12, %v2808_v8  ;;  %v5252_v49 = vunpack.i.l.bf16 %v6540_v44  ;;  %v3495_v12 = vld [vmem:[%s7326_s2 + $0x10] sm:$0xff] }
 0x142   : > { %4609 = vmatpush3.bf16.msra.mxu1 %v4606_v58  ;;  %4406 = vmatprep.mubr.msk.f32.mxu1 %vm344_vm2, %v6065_v34  ;;  %v5237_v34 = vunpack.i.l.bf16 %v6243_v52  ;;  %v5263_v52 = vunpack.i.h.bf16 %v6571_v6  ;;  %v4644_v62 = vpack.c.bf16 %v2804_v39, %v2801_v3  ;;  %v7374_v58 = vld [vmem:[#allocation8_spill] sm:$0xff]  ;;  %v4136_v6 = vld [vmem:[%s7325_s1 + $0x248] sm:$0xff] }
 0x143   : > { %4619 = vmatprep.subr.bf16.mxu1 %v6179_v5  ;;  %2237 = vmatprep.mubr.f32.mxu0 %v7352_v43 }
 0x144   : > { %v2807_v4 = vsel %vm2800_vm7, %v5237_v34, %v5227_v0  ;;  %v5277_v0 = vunpack.i.l.bf16 %v6709_v32  ;;  %v4168_v32 = vld [vmem:[%s7325_s1 + $0x2a8] sm:$0xff] }
 0x145   : > { %4407 = vmatmul.mubr.msk.f32.gmra.mrb[24].mxu1 %vm344_vm2, %v6107_v19  ;;  %4092 = vmatmul.mubr.msk.f32.gmra.mrb[18].mxu0 %vm344_vm2, %v6553_v13  ;;  %v6589_v19 = vld [vmem:[%s7325_s1 + $0x1e0] sm:$0xff]  ;;  %v4648_v22 = vpack.c.bf16 %v2810_v59, %v2807_v4  ;;  %v5258_v4 = vunpack.i.h.bf16 %v6542_v9 }
 0x146   : > { %4409 = vmatprep.mubr.msk.f32.mxu1 %vm344_vm2, %v6127_v15  ;;  %2551 = vmatprep.mubr.f32.mxu0 %v7352_v43  ;;  %v3170_v15 = vsel %vm3168_vm8, %v5262_v20, %v5263_v52  ;;  %v3176_v25 = vsel %vm3168_vm8, %v5277_v0, %v5278_v31 }
 0x147   : > { %v4658_v37 = vpack.c.bf16 %v3173_v63, %v3170_v15  ;;  %v3497_v63 = vld [vmem:[%s7326_s2 + $0x20] sm:$0xff] }
 0x149   : > { %4410 = vmatmul.mubr.msk.f32.gmra.mrb[26].mxu1 %vm344_vm2, %v6147_v51  ;;  %4113 = vmatmul.mubr.msk.f32.vlgmr.msra.gmra.mrb[0].mxu0 %vm344_vm2, %v6589_v19  ;;  %v6613_v51 = vld [vmem:[%s7325_s1 + $0x1e8] sm:$0xff] }
 0x14a   : > { %4412 = vmatprep.mubr.msk.f32.mxu1 %vm344_vm2, %v6168_v54  ;;  %2557 = vmatprep.mubr.f32.mxu0 %v7352_v43  ;;  %v6625_v54 = vld [vmem:[%s7325_s1 + $0x1f0] sm:$0xff] }
 0x14b   : > { %4645 = vmatpush1.bf16.msra.mxu0 %v4644_v62 }
 0x14c   : > { %4647 = vmatprep.subr.bf16.mxu0 %v4646_v36  ;;  %v5257_v36 = vunpack.i.l.bf16 %v6542_v9  ;;  %v4135_v9 = vld [vmem:[%s7325_s1 + $0x240] sm:$0xff] }
 0x14d   : > { %4413 = vmatmul.mubr.msk.f32.gmra.mrb[28].mxu1 %vm344_vm2, %v7372_v24  ;;  %4114 = vmatmul.mubr.msk.f32.gmra.mrb[2].mxu0 %vm344_vm2, %v6613_v51  ;;  %v2812_v24 = vsel %vm2800_vm7, %v5233_v27, %v5258_v4  ;;  %v3502_v27 = vld [vmem:[%s7326_s2 + $0x48] sm:$0xff] }
 0x14e   : > { %4423 = vmatprep.mubr.msk.f32.mxu1 %vm344_vm2, %v7373_v1  ;;  %2563 = vmatprep.mubr.f32.mxu0 %v7352_v43 }
 0x14f   : > { %4649 = vmatpush1.bf16.msra.mxu0 %v4648_v22 }
 0x150   : > { %4659 = vmatprep.subr.bf16.mxu0 %v4658_v37 }
 0x151   : > { %4424 = vmatmul.mubr.msk.f32.vlgmr.msra.gmra.mrb[20].mxu1 %vm344_vm2, %v6263_v45  ;;  %4115 = vmatmul.mubr.msk.f32.gmra.mrb[4].mxu0 %vm344_vm2, %v6625_v54  ;;  %v5464_v45 = vmov 0  }
 0x152   : > { %4621 = vmatpush3.bf16.msra.mxu1 %v6179_v5  ;;  %4426 = vmatprep.mubr.msk.f32.mxu1 %vm344_vm2, %v6278_v38  ;;  %v6651_v5 = vld [vmem:[%s7325_s1 + $0x200] sm:$0xff] }
 0x153   : > { %4623 = vmatprep.subr.bf16.mxu1 %v7374_v58  ;;  %2569 = vmatprep.mubr.f32.mxu0 %v7352_v43  ;;  %v3493_v38 = vld [vmem:[%s7326_s2] sm:$0xff] }
 0x154   : > { %5299 = vset.pattern.permute.xlu0 %v5464_v45  ;;  %5300 = vset.pattern.permute.xlu1 %v5464_v45 }
 0x155   : > { %4427 = vmatmul.mubr.msk.f32.gmra.mrb[22].mxu1 %vm344_vm2, %v6303_v48  ;;  %4116 = vmatmul.mubr.msk.f32.gmra.mrb[6].mxu0 %vm344_vm2, %v6637_v56  ;;  %v3494_v48 = vld [vmem:[%s7326_s2 + $0x8] sm:$0xff] }
 0x156   : > { %4625 = vmatpush3.bf16.msra.mxu1 %v7374_v58  ;;  %4429 = vmatprep.mubr.msk.f32.mxu1 %vm344_vm2, %v6316_v61  ;;  %v6671_v61 = vld [vmem:[%s7325_s1 + $0x208] sm:$0xff] }
 0x157   : > { %4635 = vmatprep.subr.bf16.mxu1 %v6282_v10  ;;  %2575 = vmatprep.mubr.f32.mxu0 %v7352_v43 }
 0x158   : > { %3505 = vperm.xlu0 %5299, %v3493_v38   ;;  %3510 = vperm.xlu1 %5300, %v3494_v48   ;;  %v4140_v48 = vld [vmem:[%s7325_s1 + $0x268] sm:$0xff] }
 0x159   : > { %4430 = vmatmul.mubr.msk.f32.gmra.mrb[24].mxu1 %vm344_vm2, %v6327_v47  ;;  %4117 = vmatmul.mubr.msk.f32.gmra.mrb[8].mxu0 %vm344_vm2, %v6651_v5  ;;  %v6683_v47 = vld [vmem:[%s7325_s1 + $0x210] sm:$0xff] }
 0x15a   : > { %4432 = vmatprep.mubr.msk.f32.mxu1 %vm344_vm2, %v6339_v57  ;;  %2581 = vmatprep.mubr.f32.mxu0 %v7352_v43  ;;  %v5253_v57 = vunpack.i.h.bf16 %v6540_v44  ;;  %v5286_v44 = vpop.permute.xlu1 %5285 }
 0x15b   : > { %v5288_v39 = vunpack.i.h.bf16 %v5286_v44 }
 0x15c   : > { %3515 = vperm.xlu1 %5300, %v3495_v12  }
 0x15d   : > { %4433 = vmatmul.mubr.msk.f32.gmra.mrb[26].mxu1 %vm344_vm2, %v6353_v35  ;;  %4118 = vmatmul.mubr.msk.f32.gmra.mrb[10].mxu0 %vm344_vm2, %v6671_v61  ;;  %v6697_v35 = vld [vmem:[%s7325_s1 + $0x218] sm:$0xff] }
 0x15e   : > { %4435 = vmatprep.mubr.msk.f32.mxu1 %vm344_vm2, %v6366_v50  ;;  %2587 = vmatprep.mubr.f32.mxu0 %v7352_v43  ;;  %v5271_v50 = vpop.permute.xlu0 %5270 }
 0x15f   : > { %v5273_v18 = vunpack.i.h.bf16 %v5271_v50  ;;  %v5272_v26 = vunpack.i.l.bf16 %v5271_v50  ;;  %v4165_v50 = vld [vmem:[%s7325_s1 + $0x290] sm:$0xff] }
 0x160   : > { %3525 = vperm.xlu1 %5300, %v3497_v63  }
 0x161   : > { %4436 = vmatmul.mubr.msk.f32.gmra.mrb[28].mxu1 %vm344_vm2, %v6378_v2  ;;  %4119 = vmatmul.mubr.msk.f32.gmra.mrb[12].mxu0 %vm344_vm2, %v6683_v47  ;;  %v2803_v2 = vsel %vm2800_vm7, %v5213_v29, %v5252_v49  ;;  %v3169_v3 = vsel %vm3168_vm8, %v5272_v26, %v5262_v20  ;;  %v4163_v49 = vld [vmem:[%s7325_s1 + $0x280] sm:$0xff] }
 0x162   : > { %4446 = vmatprep.mubr.msk.f32.mxu1 %vm344_vm2, %v6401_v17  ;;  %2593 = vmatprep.mubr.f32.mxu0 %v7352_v43  ;;  %v2806_v17 = vsel %vm2800_vm7, %v5218_v46, %v5253_v57  ;;  %v6723_v46 = vpop.permute.xlu0 %5280  ;;  %v4142_v57 = vld [vmem:[%s7325_s1 + $0x278] sm:$0xff]  ;;  %v4171_v26 = vld [vmem:[%s7325_s1 + $0x2c0] sm:$0xff] }
 0x163   : > { %v6721_v29 = vpack.c.bf16 %v2806_v17, %v2803_v2  ;;  %v4166_v2 = vld [vmem:[%s7325_s1 + $0x298] sm:$0xff]  ;;  %v4167_v17 = vld [vmem:[%s7325_s1 + $0x2a0] sm:$0xff] }
 0x165   : > { %4447 = vmatmul.mubr.msk.f32.vlgmr.msra.gmra.mrb[20].mxu1 %vm344_vm2, %v6423_v42  ;;  %4120 = vmatmul.mubr.msk.f32.gmra.mrb[14].mxu0 %vm344_vm2, %v6697_v35  ;;  %v6717_v42 = vld [vmem:[%s7325_s1 + $0x220] sm:$0xff] }
 0x166   : > { %4637 = vmatpush3.bf16.msra.mxu1 %v6282_v10  ;;  %4449 = vmatprep.mubr.msk.f32.mxu1 %vm344_vm2, %v6442_v11  ;;  %v5283_v10 = vunpack.i.h.bf16 %v6723_v46  ;;  %v5282_v11 = vunpack.i.l.bf16 %v6723_v46  ;;  %v5291_v59 = vpop.permute.xlu0 %5290 }
 0x167   : > { %4639 = vmatprep.subr.bf16.mxu1 %v6290_v7  ;;  %2599 = vmatprep.mubr.f32.mxu0 %v7352_v43  ;;  %v5293_v22 = vunpack.i.h.bf16 %v5291_v59  ;;  %v5292_v37 = vunpack.i.l.bf16 %v5291_v59 }
 0x168   : > { %v3179_v34 = vsel %vm3168_vm8, %v5282_v11, %v5283_v10  ;;  %v3178_v20 = vsel %vm3168_vm8, %v5288_v39, %v5282_v11 }
 0x169   : > { %4450 = vmatmul.mubr.msk.f32.gmra.mrb[22].mxu1 %vm344_vm2, %v6466_v30  ;;  %4121 = vmatmul.mubr.msk.f32.gmra.mrb[16].mxu0 %vm344_vm2, %v6717_v42  ;;  %v6739_v30 = vld [vmem:[%s7325_s1 + $0x228] sm:$0xff]  ;;  %v4662_v62 = vpack.c.bf16 %v3179_v34, %v3176_v25  ;;  %v3171_v1 = vsel %vm3168_vm8, %v5263_v52, %v5292_v37  ;;  %v3174_v40 = vsel %vm3168_vm8, %v5268_v28, %v5293_v22  ;;  %v3500_v52 = vld [vmem:[%s7326_s2 + $0x38] sm:$0xff]  ;;  %v4137_v28 = vld [vmem:[%s7325_s1 + $0x250] sm:$0xff] }
 0x16a   : > { %4641 = vmatpush3.bf16.msra.mxu1 %v6290_v7  ;;  %4452 = vmatprep.mubr.msk.f32.mxu1 %vm344_vm2, %v6482_v41  ;;  %v3172_v7 = vsel %vm3168_vm8, %v5273_v18, %v5267_v60  ;;  %v5287_v41 = vunpack.i.l.bf16 %v5286_v44  ;;  %v4666_v53 = vpack.c.bf16 %v3174_v40, %v3171_v1  ;;  %v4170_v18 = vld [vmem:[%s7325_s1 + $0x2b8] sm:$0xff] }
 0x16b   : > { %4651 = vmatprep.subr.bf16.mxu1 %v6721_v29  ;;  %2605 = vmatprep.mubr.f32.mxu0 %v7352_v43  ;;  %v4660_v8 = vpack.c.bf16 %v3172_v7, %v3169_v3 }
 0x16c   : > { %v3175_v60 = vsel %vm3168_vm8, %v5287_v41, %v5277_v0 }
 0x16d   : > { %4453 = vmatmul.mubr.msk.f32.gmra.mrb[24].mxu1 %vm344_vm2, %v6495_v21  ;;  %4122 = vmatmul.mubr.msk.f32.gmra.mrb[18].mxu0 %vm344_vm2, %v6739_v30  ;;  %v6765_v21 = vld [vmem:[%s7325_s1 + $0x230] sm:$0xff]  ;;  %v4664_v15 = vpack.c.bf16 %v3178_v20, %v3175_v60 }
 0x16e   : > { %4455 = vmatprep.mubr.msk.f32.mxu1 %vm344_vm2, %v6507_v55  ;;  %2919 = vmatprep.mubr.f32.mxu0 %v7352_v43  ;;  %v3496_v55 = vld [vmem:[%s7326_s2 + $0x18] sm:$0xff] }
 0x16f   : > { %3520 = vperm.xlu0 %5299, %v3496_v55  }
 0x171   : > { %4456 = vmatmul.mubr.msk.f32.gmra.mrb[26].mxu1 %vm344_vm2, %v6518_v14  ;;  %4143 = vmatmul.mubr.msk.f32.vlgmr.msra.gmra.mrb[0].mxu0 %vm344_vm2, %v6765_v21  ;;  %v6787_v14 = vld [vmem:[%s7325_s1 + $0x238] sm:$0xff] }
 0x172   : > { %4458 = vmatprep.mubr.msk.f32.mxu1 %vm344_vm2, %v6531_v16  ;;  %2925 = vmatprep.mubr.f32.mxu0 %v7352_v43  ;;  %v3498_v16 = vld [vmem:[%s7326_s2 + $0x28] sm:$0xff] }
 0x173   : > { %4661 = vmatpush1.bf16.msra.mxu0 %v4660_v8  ;;  %3530 = vperm.xlu0 %5299, %v3498_v16  }
 0x174   : > { %4663 = vmatprep.subr.bf16.mxu0 %v4662_v62 }
 0x175   : > { %4459 = vmatmul.mubr.msk.f32.gmra.mrb[28].mxu1 %vm344_vm2, %v6553_v13  ;;  %4144 = vmatmul.mubr.msk.f32.gmra.mrb[2].mxu0 %vm344_vm2, %v6787_v14  ;;  %v2809_v13 = vsel %vm2800_vm7, %v5228_v33, %v5257_v36  ;;  %v3499_v33 = vld [vmem:[%s7326_s2 + $0x30] sm:$0xff] }
 0x176   : > { %4469 = vmatprep.mubr.msk.f32.mxu1 %vm344_vm2, %v6589_v19  ;;  %2931 = vmatprep.mubr.f32.mxu0 %v7352_v43  ;;  %v3501_v19 = vld [vmem:[%s7326_s2 + $0x40] sm:$0xff]  ;;  %v4654_v23 = vpack.c.bf16 %v2812_v24, %v2809_v13 }
 0x177   : > { %4665 = vmatpush1.bf16.msra.mxu0 %v4664_v15  ;;  %3545 = vperm.xlu1 %5300, %v3501_v19  }
 0x178   : > { %3550 = vperm.xlu0 %5299, %v3502_v27  }
 0x179   : > { %4470 = vmatmul.mubr.msk.f32.vlgmr.msra.gmra.mrb[20].mxu1 %vm344_vm2, %v6613_v51  ;;  %4145 = vmatmul.mubr.msk.f32.gmra.mrb[4].mxu0 %vm344_vm2, %v4135_v9  ;;  %v5296_v51 = vpop.permute.xlu1 %5295 }
 0x17a   : > { %4653 = vmatpush3.bf16.msra.mxu1 %v6721_v29  ;;  %4472 = vmatprep.mubr.msk.f32.mxu1 %vm344_vm2, %v6625_v54  ;;  %v4138_v54 = vld [vmem:[%s7325_s1 + $0x258] sm:$0xff]  ;;  %v5297_v58 = vunpack.i.l.bf16 %v5296_v51  ;;  %v4172_v29 = vld [vmem:[%s7325_s1 + $0x2c8] sm:$0xff] }
 0x17b   : > { %4655 = vmatprep.subr.bf16.mxu1 %v4654_v23  ;;  %2937 = vmatprep.mubr.f32.mxu0 %v7352_v43 }
 0x17c   : > { %3535 = vperm.xlu1 %5300, %v3499_v33   ;;  %3540 = vperm.xlu0 %5299, %v3500_v52   ;;  %v3177_v45 = vsel %vm3168_vm8, %v5278_v31, %v5297_v58 }
 0x17d   : > { %4473 = vmatmul.mubr.msk.f32.gmra.mrb[22].mxu1 %vm344_vm2, %v6637_v56  ;;  %4146 = vmatmul.mubr.msk.f32.gmra.mrb[6].mxu0 %vm344_vm2, %v4136_v6  ;;  %v5298_v56 = vunpack.i.h.bf16 %v5296_v51 }
 0x17e   : > { %4657 = vmatpush3.bf16.msra.mxu1 %v4654_v23  ;;  %4475 = vmatprep.mubr.msk.f32.mxu1 %vm344_vm2, %v6651_v5  ;;  %v4139_v5 = vld [vmem:[%s7325_s1 + $0x260] sm:$0xff] }
 0x17f   : > { %4667 = vmatprep.subr.bf16.mxu1 %v4666_v53  ;;  %2943 = vmatprep.mubr.f32.mxu0 %v7352_v43  ;;  %v3180_v38 = vsel %vm3168_vm8, %v5283_v10, %v5298_v56 }
 0x181   : > { %4476 = vmatmul.mubr.msk.f32.gmra.mrb[24].mxu1 %vm344_vm2, %v6671_v61  ;;  %4147 = vmatmul.mubr.msk.f32.gmra.mrb[8].mxu0 %vm344_vm2, %v4137_v28  ;;  %v4670_v61 = vpack.c.bf16 %v3180_v38, %v3177_v45 }
 0x182   : > { %4478 = vmatprep.mubr.msk.f32.mxu1 %vm344_vm2, %v6683_v47  ;;  %2949 = vmatprep.mubr.f32.mxu0 %v7352_v43  ;;  %v4141_v47 = vld [vmem:[%s7325_s1 + $0x270] sm:$0xff] }
 0x185   : > { %4479 = vmatmul.mubr.msk.f32.gmra.mrb[26].mxu1 %vm344_vm2, %v6697_v35  ;;  %4148 = vmatmul.mubr.msk.f32.gmra.mrb[10].mxu0 %vm344_vm2, %v4138_v54  ;;  %v4164_v35 = vld [vmem:[%s7325_s1 + $0x288] sm:$0xff] }
 0x186   : > { %4481 = vmatprep.mubr.msk.f32.mxu1 %vm344_vm2, %v6717_v42  ;;  %2955 = vmatprep.mubr.f32.mxu0 %v7352_v43  ;;  %v4169_v42 = vld [vmem:[%s7325_s1 + $0x2b0] sm:$0xff] }
 0x189   : > { %4482 = vmatmul.mubr.msk.f32.gmra.mrb[28].mxu1 %vm344_vm2, %v6739_v30  ;;  %4149 = vmatmul.mubr.msk.f32.gmra.mrb[12].mxu0 %vm344_vm2, %v4139_v5 }
 0x18a   : > { %4492 = vmatprep.mubr.msk.f32.mxu1 %vm344_vm2, %v6765_v21  ;;  %2961 = vmatprep.mubr.f32.mxu0 %v7352_v43 }
 0x18d   : > { %4493 = vmatmul.mubr.msk.f32.vlgmr.msra.gmra.mrb[20].mxu1 %vm344_vm2, %v6787_v14  ;;  %4150 = vmatmul.mubr.msk.f32.gmra.mrb[14].mxu0 %vm344_vm2, %v4140_v48 }
 0x18e   : > { %4669 = vmatpush3.bf16.msra.mxu1 %v4666_v53  ;;  %4495 = vmatprep.mubr.msk.f32.mxu1 %vm344_vm2, %v4135_v9 }
 0x18f   : > { %4671 = vmatprep.subr.bf16.mxu1 %v4670_v61  ;;  %2967 = vmatprep.mubr.f32.mxu0 %v7352_v43 }
 0x191   : > { %4496 = vmatmul.mubr.msk.f32.gmra.mrb[22].mxu1 %vm344_vm2, %v4136_v6  ;;  %4151 = vmatmul.mubr.msk.f32.gmra.mrb[16].mxu0 %vm344_vm2, %v4141_v47 }
 0x192   : > { %4673 = vmatpush3.bf16.msra.mxu1 %v4670_v61  ;;  %4498 = vmatprep.mubr.msk.f32.mxu1 %vm344_vm2, %v4137_v28 }
 0x193   : > { %2973 = vmatprep.mubr.f32.mxu0 %v7352_v43 }
 0x195   : > { %4499 = vmatmul.mubr.msk.f32.gmra.mrb[24].mxu1 %vm344_vm2, %v4138_v54  ;;  %4152 = vmatmul.mubr.msk.f32.gmra.mrb[18].mxu0 %vm344_vm2, %v4142_v57 }
 0x196   : > { %4501 = vmatprep.mubr.msk.f32.mxu1 %vm344_vm2, %v4139_v5  ;;  %3287 = vmatprep.mubr.f32.mxu0 %v7352_v43 }
 0x199   : > { %4502 = vmatmul.mubr.msk.f32.gmra.mrb[26].mxu1 %vm344_vm2, %v4140_v48  ;;  %4173 = vmatmul.mubr.msk.f32.vlgmr.msra.gmra.mrb[0].mxu0 %vm344_vm2, %v4163_v49 }
 0x19a   : > { %4504 = vmatprep.mubr.msk.f32.mxu1 %vm344_vm2, %v4141_v47  ;;  %3293 = vmatprep.mubr.f32.mxu0 %v7352_v43 }
 0x19d   : > { %4505 = vmatmul.mubr.msk.f32.gmra.mrb[28].mxu1 %vm344_vm2, %v4142_v57  ;;  %4174 = vmatmul.mubr.msk.f32.gmra.mrb[2].mxu0 %vm344_vm2, %v4164_v35 }
 0x19e   : > { %4515 = vmatprep.mubr.msk.f32.mxu1 %vm344_vm2, %v4163_v49  ;;  %3299 = vmatprep.mubr.f32.mxu0 %v7352_v43 }
 0x1a1   : > { %4516 = vmatmul.mubr.msk.f32.vlgmr.msra.gmra.mrb[20].mxu1 %vm344_vm2, %v4164_v35  ;;  %4175 = vmatmul.mubr.msk.f32.gmra.mrb[4].mxu0 %vm344_vm2, %v4165_v50 }
 0x1a2   : > { %4518 = vmatprep.mubr.msk.f32.mxu1 %vm344_vm2, %v4165_v50  ;;  %3305 = vmatprep.mubr.f32.mxu0 %v7352_v43 }
 0x1a5   : > { %4519 = vmatmul.mubr.msk.f32.gmra.mrb[22].mxu1 %vm344_vm2, %v4166_v2  ;;  %4176 = vmatmul.mubr.msk.f32.gmra.mrb[6].mxu0 %vm344_vm2, %v4166_v2 }
 0x1a6   : > { %4521 = vmatprep.mubr.msk.f32.mxu1 %vm344_vm2, %v4167_v17  ;;  %3311 = vmatprep.mubr.f32.mxu0 %v7352_v43 }
 0x1a9   : > { %4522 = vmatmul.mubr.msk.f32.gmra.mrb[24].mxu1 %vm344_vm2, %v4168_v32  ;;  %4177 = vmatmul.mubr.msk.f32.gmra.mrb[8].mxu0 %vm344_vm2, %v4167_v17 }
 0x1aa   : > { %4524 = vmatprep.mubr.msk.f32.mxu1 %vm344_vm2, %v4169_v42  ;;  %3317 = vmatprep.mubr.f32.mxu0 %v7352_v43 }
 0x1ad   : > { %4525 = vmatmul.mubr.msk.f32.gmra.mrb[26].mxu1 %vm344_vm2, %v4170_v18  ;;  %4178 = vmatmul.mubr.msk.f32.gmra.mrb[10].mxu0 %vm344_vm2, %v4168_v32 }
 0x1ae   : > { %4527 = vmatprep.mubr.msk.f32.mxu1 %vm344_vm2, %v4171_v26  ;;  %3323 = vmatprep.mubr.f32.mxu0 %v7352_v43 }
 0x1b1   : > { %4528 = vmatmul.mubr.msk.f32.gmra.mrb[28].mxu1 %vm344_vm2, %v4172_v29  ;;  %4179 = vmatmul.mubr.msk.f32.gmra.mrb[12].mxu0 %vm344_vm2, %v4169_v42 }
 0x1b2   : > { %3329 = vmatprep.mubr.f32.mxu0 %v7352_v43 }
 0x1b5   : > { %4180 = vmatmul.mubr.msk.f32.gmra.mrb[14].mxu0 %vm344_vm2, %v4170_v18 }
 0x1b6   : > { %3335 = vmatprep.mubr.f32.mxu0 %v7352_v43 }
 0x1b8   : > { %v768_v46 = vpop.f32.mrb[0].mxu1 }
 0x1b9   : > { %v770_v10 = vpop.f32.mrb[1].mxu1  ;;  %4181 = vmatmul.mubr.msk.f32.gmra.mrb[16].mxu0 %vm344_vm2, %v4171_v26 }
 0x1ba   : > { %3341 = vmatprep.mubr.f32.mxu0 %v7352_v43 }
 0x1bc   : > { %v774_v11 = vpop.f32.mrb[2].mxu1 }
 0x1bd   : > { %v776_v31 = vpop.f32.mrb[3].mxu1  ;;  %4182 = vmatmul.mubr.msk.f32.gmra.mrb[18].mxu0 %vm344_vm2, %v4172_v29 }
 0x1c0   : > { %v780_v0 = vpop.f32.mrb[4].mxu1 }
 0x1c1   : > { %v782_v30 = vpop.f32.mrb[5].mxu1 }
 0x1c4   : > { %v786_v44 = vpop.f32.mrb[6].mxu1 }
 0x1c5   : > { %v788_v3 = vpop.f32.mrb[7].mxu1 }
 0x1c8   : > { %v792_v7 = vpop.f32.mrb[8].mxu1 }
 0x1c9   : > { %v6962_v39 = vpop.f32.mrb[9].mxu1 }
 0x1cc   : > { %v6964_v41 = vpop.f32.mrb[10].mxu1 }
 0x1cd   : > { %v6966_v25 = vpop.f32.mrb[11].mxu1 }
 0x1d0   : > { %v6968_v34 = vpop.f32.mrb[12].mxu1 }
 0x1d1   : > { %v6970_v21 = vpop.f32.mrb[13].mxu1 }
 0x1d4   : > { %v6972_v43 = vpop.f32.mrb[14].mxu1 }
 0x1d5   : > { %v6974_v8 = vpop.f32.mrb[15].mxu1 }
 0x1d7   : > { %v3511_v36 = vpop.permute.xlu1 %3510  ;;  %v3506_v63 = vpop.permute.xlu0 %3505 }
 0x1db   : > { %v3516_v24 = vpop.permute.xlu1 %3515 }
 0x1df   : > { %v3526_v17 = vpop.permute.xlu1 %3525 }
 0x1ee   : > { %v3521_v56 = vpop.permute.xlu0 %3520 }
 0x1f4   : > { %v6976_v12 = vpop.f32.mrb[16].mxu1 }
 0x1f5   : > { %v6978_v20 = vpop.f32.mrb[17].mxu1 }
 0x1f8   : > { %v6980_v60 = vpop.f32.mrb[18].mxu1 }
 0x1f9   : > { %v6982_v62 = vpop.f32.mrb[19].mxu1 }
 0x26c   : > { %v3289_v59 = vpop.f32.mrb[0].mxu0 }
 0x26d   : > { %v4678_v55 = vadd.f32 %v3289_v59, %v768_v46  ;;  %v3291_v4 = vpop.f32.mrb[1].mxu0 }
 0x26e   : > { %v4679_v14 = vadd.f32 %v3291_v4, %v770_v10 }
 0x26f   : > { %v6984_v9 = vadd.f32 %v4678_v55, %v3506_v63  ;;  %v3531_v55 = vpop.permute.xlu0 %3530 }
 0x270   : > { %v3295_v15 = vpop.f32.mrb[2].mxu0  ;;  %v6988_v19 = vadd.f32 %v4679_v14, %v3506_v63 }
 0x271   : > { %v4680_v22 = vadd.f32 %v3295_v15, %v774_v11  ;;  %v3297_v37 = vpop.f32.mrb[3].mxu0 }
 0x272   : > { %v4681_v16 = vadd.f32 %v3297_v37, %v776_v31 }
 0x273   : > { %v6986_v13 = vadd.f32 %v4680_v22, %v3511_v36 }
 0x274   : > { %v6990_v1 = vadd.f32 %v4681_v16, %v3511_v36  ;;  %v4517_v40 = vpop.f32.mrb[20].mxu1  ;;  %v3301_v23 = vpop.f32.mrb[4].mxu0 }
 0x275   : > { %v3583_v27 = vmax.f32 %v6984_v9, %v6986_v13  ;;  %v3558_v33 = vadd.f32 %v4517_v40, %v3511_v36  ;;  %v4682_v6 = vadd.f32 %v3301_v23, %v780_v0  ;;  %v3414_v53 = vpop.f32.mrb[21].mxu1  ;;  %v3303_v52 = vpop.f32.mrb[5].mxu0 }
 0x276   : > { %v3584_v28 = vmax.f32 %v6988_v19, %v6990_v1  ;;  %v3555_v51 = vadd.f32 %v3506_v63, %v3414_v53  ;;  %v4683_v54 = vadd.f32 %v3303_v52, %v782_v30 }
 0x277   : > { %v6996_v58 = vadd.f32 %v4682_v6, %v3516_v24 }
 0x278   : > { %v3585_v5 = vmax.f32 %v3555_v51, %v3558_v33  ;;  %v6998_v45 = vadd.f32 %v4683_v54, %v3516_v24  ;;  %v4520_v38 = vpop.f32.mrb[22].mxu1  ;;  %v3307_v48 = vpop.f32.mrb[6].mxu0 }
 0x279   : > { %v3586_v61 = vmax.f32 %v3583_v27, %v6996_v58  ;;  %v4684_v47 = vadd.f32 %v3307_v48, %v786_v44  ;;  %v3424_v57 = vpop.f32.mrb[23].mxu1  ;;  %v3309_v49 = vpop.f32.mrb[7].mxu0  ;;  %v3564_v42 = vadd.f32 %v4520_v38, %v3521_v56 }
 0x27a   : > { %v3587_v35 = vmax.f32 %v3584_v28, %v6998_v45  ;;  %v3561_v50 = vadd.f32 %v3516_v24, %v3424_v57  ;;  %v4685_v2 = vadd.f32 %v3309_v49, %v788_v3 }
 0x27b   : > { %v7002_v32 = vadd.f32 %v4684_v47, %v3521_v56 }
 0x27c   : > { %v3588_v18 = vmax.f32 %v3585_v5, %v3561_v50  ;;  %v7004_v26 = vadd.f32 %v4685_v2, %v3521_v56  ;;  %v4523_v29 = vpop.f32.mrb[24].mxu1  ;;  %v3313_v46 = vpop.f32.mrb[8].mxu0 }
 0x27d   : > { %v3589_v10 = vmax.f32 %v3586_v61, %v7002_v32  ;;  %v4686_v11 = vadd.f32 %v3313_v46, %v792_v7  ;;  %v3434_v31 = vpop.f32.mrb[25].mxu1  ;;  %v3315_v0 = vpop.f32.mrb[9].mxu0  ;;  %v3570_v36 = vadd.f32 %v4523_v29, %v3531_v55 }
 0x27e   : > { %v3590_v30 = vmax.f32 %v3587_v35, %v7004_v26  ;;  %v3567_v44 = vadd.f32 %v3526_v17, %v3434_v31  ;;  %v3591_v59 = vmax.f32 %v3588_v18, %v3564_v42  ;;  %v4687_v3 = vadd.f32 %v3315_v0, %v6962_v39 }
 0x27f   : > { %v3565_v4 = vadd.f32 %v4686_v11, %v3526_v17 }
 0x280   : > { %v3594_v14 = vmax.f32 %v3591_v59, %v3567_v44  ;;  %v7009_v15 = vadd.f32 %v4687_v3, %v3526_v17  ;;  %v7011_v63 = vpop.f32.mrb[26].mxu1  ;;  %v3319_v22 = vpop.f32.mrb[10].mxu0 }
 0x281   : > { %v3592_v37 = vmax.f32 %v3589_v10, %v3565_v4  ;;  %v4688_v7 = vadd.f32 %v3319_v22, %v6964_v41  ;;  %v7014_v16 = vpop.f32.mrb[27].mxu1  ;;  %v3321_v24 = vpop.f32.mrb[11].mxu0 }
 0x282   : > { %v3597_v40 = vmax.f32 %v3594_v14, %v3570_v36  ;;  %v3593_v23 = vmax.f32 %v3590_v30, %v7009_v15  ;;  %v4689_v39 = vadd.f32 %v3321_v24, %v6966_v25  ;;  %v7024_v30 = vpop.permute.xlu0 %3550  ;;  %v7027_v59 = vpop.permute.xlu1 %3545 }
 0x283   : > { %v3568_v27 = vadd.f32 %v4688_v7, %v3531_v55 }
 0x284   : > { %v3600_v6 = vsub.f32 %v3555_v51, %v3597_v40  ;;  %v3603_v53 = vsub.f32 %v3558_v33, %v3597_v40  ;;  %v3606_v52 = vsub.f32 %v3561_v50, %v3597_v40  ;;  %v3609_v28 = vsub.f32 %v3564_v42, %v3597_v40  ;;  %v4529_v54 = vpop.f32.mrb[28].mxu1  ;;  %v3325_v56 = vpop.f32.mrb[12].mxu0 }
 0x285   : > { %v3612_v5 = vsub.f32 %v3567_v44, %v3597_v40  ;;  %v3615_v38 = vsub.f32 %v3570_v36, %v3597_v40  ;;  %v3595_v48 = vmax.f32 %v3592_v37, %v3568_v27  ;;  %v3454_v61 = vpop.f32.mrb[29].mxu1  ;;  %v3327_v41 = vpop.f32.mrb[13].mxu0  ;;  %v7018_v17 = vadd.f32 %v4689_v39, %v3531_v55 }
 0x286   : > { %v3620_v47 = vmul.f32 1.442695, %v3600_v6  ;;  %v3626_v57 = vmul.f32 1.442695, %v3603_v53  ;;  %v3632_v49 = vmul.f32 1.442695, %v3606_v52  ;;  %v7031_v3 = vadd.f32 %v3325_v56, %v6968_v34 }
 0x287   : > { %v3638_v35 = vmul.f32 1.442695, %v3609_v28  ;;  %v3644_v2 = vmul.f32 1.442695, %v3612_v5  ;;  %v3598_v25 = vsub.f32 %v6984_v9, %v3595_v48  ;;  %v3601_v33 = vsub.f32 %v6986_v13, %v3595_v48 }
 0x288   : > { %5301 = vpow2.f32 %v3620_v47  ;;  %v3604_v51 = vsub.f32 %v6996_v58, %v3595_v48  ;;  %v3331_v50 = vpop.f32.mrb[14].mxu0  ;;  %v3607_v42 = vsub.f32 %v7002_v32, %v3595_v48  ;;  %v3610_v18 = vsub.f32 %v3565_v4, %v3595_v48 }
 0x289   : > { %5303 = vpow2.f32 %v3626_v57  ;;  %v3613_v29 = vsub.f32 %v3568_v27, %v3595_v48  ;;  %v3333_v46 = vpop.f32.mrb[15].mxu0  ;;  %v3616_v10 = vmul.f32 1.442695, %v3598_v25  ;;  %v3650_v11 = vmul.f32 1.442695, %v3615_v38 }
 0x28a   : > { %5305 = vpow2.f32 %v3632_v49  ;;  %v3622_v31 = vmul.f32 1.442695, %v3601_v33  ;;  %v3628_v0 = vmul.f32 1.442695, %v3604_v51  ;;  %v3634_v9 = vmul.f32 1.442695, %v3607_v42 }
 0x28b   : > { %5307 = vpow2.f32 %v3638_v35  ;;  %v3640_v44 = vmul.f32 1.442695, %v3610_v18  ;;  %v3596_v13 = vmax.f32 %v3593_v23, %v7018_v17  ;;  %v3582_v32 = vadd.f32 %v4529_v54, %v7024_v30 }
 0x28c   : > { %v3337_v58 = vpop.f32.mrb[16].mxu0  ;;  %5309 = vpow2.f32 %v3644_v2  ;;  %v7034_v55 = vadd.f32 %v3327_v41, %v6970_v21  ;;  %v3579_v22 = vadd.f32 %v7027_v59, %v3454_v61  ;;  %v7050_v52 = vadd.f32 %v3331_v50, %v6972_v43  ;;  %v7062_v41 = vpop.permute.xlu0 %3540 }
 0x28d   : > { %v3339_v4 = vpop.f32.mrb[17].mxu0  ;;  %5311 = vpow2.f32 %v3616_v10  ;;  %v3599_v36 = vsub.f32 %v6988_v19, %v3596_v13  ;;  %v3602_v14 = vsub.f32 %v6990_v1, %v3596_v13  ;;  %v3605_v37 = vsub.f32 %v6998_v45, %v3596_v13 }
 0x28e   : > { %5313 = vpow2.f32 %v3622_v31  ;;  %v3608_v7 = vsub.f32 %v7004_v26, %v3596_v13  ;;  %v3611_v24 = vsub.f32 %v7009_v15, %v3596_v13  ;;  %v3614_v34 = vsub.f32 %v7018_v17, %v3596_v13 }
 0x28f   : > { %5315 = vpow2.f32 %v3650_v11  ;;  %v3618_v21 = vmul.f32 1.442695, %v3599_v36  ;;  %v3624_v23 = vmul.f32 1.442695, %v3602_v14  ;;  %v3646_v19 = vmul.f32 1.442695, %v3613_v29 }
 0x290   : > { %v3343_v40 = vpop.f32.mrb[18].mxu0  ;;  %5317 = vpow2.f32 %v3628_v0  ;;  %v3750_v1 = vmul.f32 0.2, %v3582_v32  ;;  %v3630_v45 = vmul.f32 1.442695, %v3605_v37  ;;  %v7058_v48 = vadd.f32 %v3333_v46, %v6974_v8  ;;  %v3536_v8 = vpop.permute.xlu1 %3535  ;;  %v3723_v37 = vld [vmem:[%s7327_s3 + $0x40] sm:$0xff] }
 0x291   : > { %5319 = vpow2.f32 %v3634_v9  ;;  %v3747_v6 = vmul.f32 0.2, %v3579_v22  ;;  %v3345_v26 = vpop.f32.mrb[19].mxu0  ;;  %v3636_v53 = vmul.f32 1.442695, %v3608_v7  ;;  %v4694_v47 = vadd.f32 %v3337_v58, %v6976_v12 }
 0x292   : > { %v7043_v39 = vpop.eup %5301  ;;  %5321 = vpow2.f32 %v3640_v44  ;;  %v3642_v54 = vmul.f32 1.442695, %v3611_v24  ;;  %v3761_v38 = vmul.f32 1.442695, %v3750_v1  ;;  %v3576_v35 = vadd.f32 %v7011_v63, %v7062_v41 }
 0x293   : > { %v7045_v27 = vpop.eup %5303  ;;  %5323 = vpow2.f32 %v3618_v21  ;;  %v3755_v43 = vmul.f32 1.442695, %v3747_v6  ;;  %v3648_v17 = vmul.f32 1.442695, %v3614_v34  ;;  %v3577_v25 = vadd.f32 %v4694_v47, %v7027_v59 }
 0x294   : > { %v3654_v15 = vadd.f32 %v7045_v27, %v7043_v39  ;;  %v7052_v28 = vpop.eup %5305  ;;  %5325 = vpow2.f32 %v3624_v23  ;;  %v3573_v50 = vadd.f32 %v3536_v8, %v7014_v16  ;;  %v4695_v18 = vadd.f32 %v3339_v4, %v6978_v20 }
 0x295   : > { %v7054_v56 = vpop.eup %5307  ;;  %5327 = vpow2.f32 %v3646_v19  ;;  %v3745_v63 = vmul.f32 0.2, %v3577_v25  ;;  %v3732_v10 = vmul.f32 0.1, %v3576_v35  ;;  %v4696_v31 = vadd.f32 %v3343_v40, %v6980_v60  ;;  %v3726_v60 = vld [vmem:[%s7327_s3 + $0x58] sm:$0xff] }
 0x296   : > { %v3657_v5 = vadd.f32 %v7052_v28, %v3654_v15  ;;  %v7060_v61 = vpop.eup %5309  ;;  %5329 = vpow2.f32 %v3630_v45  ;;  %v3578_v9 = vadd.f32 %v4695_v18, %v7027_v59  ;;  %v4697_v44 = vadd.f32 %v3345_v26, %v6982_v62 }
 0x297   : > { %v7065_v57 = vpop.eup %5311  ;;  %5331 = vpow2.f32 %v3636_v53  ;;  %v3751_v16 = vmul.f32 1.442695, %v3745_v63  ;;  %v3729_v58 = vmul.f32 0.1, %v3573_v50  ;;  %v3580_v32 = vadd.f32 %v4696_v31, %v7024_v30 }
 0x298   : > { %v3660_v49 = vadd.f32 %v7054_v56, %v3657_v5  ;;  %v7070_v2 = vpop.eup %5313  ;;  %5333 = vpow2.f32 %v3642_v54  ;;  %v3571_v59 = vadd.f32 %v7031_v3, %v3536_v8  ;;  %v3746_v62 = vmul.f32 0.2, %v3578_v9  ;;  %v3720_v54 = vld [vmem:[%s7327_s3 + $0x28] sm:$0xff]  ;;  %v3717_v5 = vld [vmem:[%s7327_s3 + $0x10] sm:$0xff] }
 0x299   : > { %v7073_v33 = vpop.eup %5315  ;;  %v3652_v12 = vadd.f32 %v7070_v2, %v7065_v57  ;;  %5335 = vpow2.f32 %v3761_v38  ;;  %v3581_v36 = vadd.f32 %v4697_v44, %v7024_v30  ;;  %v3572_v24 = vadd.f32 %v7034_v55, %v3536_v8 }
 0x29a   : > { %v3663_v51 = vadd.f32 %v7060_v61, %v3660_v49  ;;  %v7079_v42 = vpop.eup %5317  ;;  %5337 = vpow2.f32 %v3755_v43  ;;  %v3748_v34 = vmul.f32 0.2, %v3580_v32  ;;  %v3753_v3 = vmul.f32 1.442695, %v3746_v62  ;;  %v3721_v43 = vld [vmem:[%s7327_s3 + $0x30] sm:$0xff]  ;;  %v3715_v32 = vld [vmem:[%s7327_s3] sm:$0xff] }
 0x29b   : > { %v7082_v29 = vpop.eup %5319  ;;  %v3655_v11 = vadd.f32 %v7079_v42, %v3652_v12  ;;  %5339 = vpow2.f32 %v3648_v17  ;;  %v3749_v30 = vmul.f32 0.2, %v3581_v36  ;;  %v3738_v23 = vmul.f32 %v3732_v10, %v3726_v60  ;;  %v3722_v17 = vld [vmem:[%s7327_s3 + $0x38] sm:$0xff]  ;;  %v3716_v36 = vld [vmem:[%s7327_s3 + $0x8] sm:$0xff] }
 0x29c   : > { %v7085_v46 = vadd.f32 %v7073_v33, %v3663_v51  ;;  %v7089_v0 = vpop.eup %5321  ;;  %v3757_v45 = vmul.f32 1.442695, %v3748_v34  ;;  %v3735_v55 = vmul.f32 %v3729_v58, %v3723_v37  ;;  %v3727_v26 = vmul.f32 0.1, %v3571_v59 }
 0x29d   : > { %v7093_v13 = vpop.eup %5323  ;;  %v3658_v20 = vadd.f32 %v7082_v29, %v3655_v11  ;;  %v3759_v15 = vmul.f32 1.442695, %v3749_v30  ;;  %v3728_v47 = vmul.f32 0.1, %v3572_v24  ;;  %v3574_v49 = vadd.f32 %v7050_v52, %v7062_v41 }
 0x29e   : > { %5341 = vrcp.f32 %v7085_v46  ;;  %v7098_v4 = vpop.eup %5325  ;;  %v3575_v25 = vadd.f32 %v7058_v48, %v7062_v41  ;;  %v3744_v63 = vadd.f32 %v3738_v23, %v3720_v54  ;;  %v3741_v18 = vadd.f32 %v3735_v55, %v3717_v5 }
 0x29f   : > { %5343 = vpow2.f32 %v3751_v16  ;;  %v7105_v14 = vpop.eup %5327  ;;  %v3661_v22 = vadd.f32 %v7089_v0, %v3658_v20  ;;  %v3653_v7 = vadd.f32 %v7098_v4, %v7093_v13  ;;  %v3733_v10 = vmul.f32 %v3727_v26, %v3721_v43 }
 0x2a0   : > { %v7114_v21 = vpop.eup %5329  ;;  %5345 = vpow2.f32 %v3753_v3  ;;  %v3734_v9 = vmul.f32 %v3728_v47, %v3722_v17  ;;  %v3730_v48 = vmul.f32 0.1, %v3574_v49 }
 0x2a1   : > { %v7119_v40 = vpop.eup %5331  ;;  %v7122_v19 = vadd.f32 %v7105_v14, %v3661_v22  ;;  %v3656_v1 = vadd.f32 %v7114_v21, %v3653_v7  ;;  %v3725_v7 = vld [vmem:[%s7327_s3 + $0x50] sm:$0xff]  ;;  %v3739_v24 = vadd.f32 %v3733_v10, %v3715_v32 }
 0x2a2   : > { %v7125_v6 = vpop.eup %5333  ;;  %v3740_v23 = vadd.f32 %v3734_v9, %v3716_v36 }
 0x2a3   : > { %v5336_v53 = vpop.eup %5335  ;;  %5347 = vrcp.f32 %v7122_v19  ;;  %v3659_v38 = vadd.f32 %v7119_v40, %v3656_v1 }
 0x2a4   : > { %v5338_v35 = vpop.eup %5337  ;;  %v3768_v8 = vmul.f32 %v5336_v53, %v3726_v60  ;;  %5349 = vpow2.f32 %v3757_v45  ;;  %v3731_v60 = vmul.f32 0.1, %v3575_v25 }
 0x2a5   : > { %v3662_v51 = vadd.f32 %v7125_v6, %v3659_v38  ;;  %v3765_v12 = vmul.f32 %v5338_v35, %v3723_v37  ;;  %5351 = vpow2.f32 %v3759_v15  ;;  %v7147_v50 = vpop.eup %5339 }
 0x2a6   : > { %v3774_v52 = vmul.f32 0.5, %v3768_v8  ;;  %v3737_v55 = vmul.f32 %v3731_v60, %v3725_v7 }
 0x2a7   : > { %v7150_v31 = vadd.f32 %v7147_v50, %v3662_v51  ;;  %v3771_v16 = vmul.f32 0.5, %v3765_v12 }
 0x2a8   : > { %v5342_v11 = vpop.eup %5341  ;;  %v3780_v20 = vsub.f32 %v3744_v63, %v3774_v52  ;;  %v3786_v58 = vadd.f32 %v3774_v52, %v3744_v63 }
 0x2a9   : > { %v5344_v41 = vpop.eup %5343  ;;  %v3672_v44 = vmul.f32 %v5342_v11, %v7085_v46  ;;  %5353 = vrcp.f32 %v7150_v31  ;;  %v3777_v59 = vsub.f32 %v3741_v18, %v3771_v16  ;;  %v3783_v62 = vadd.f32 %v3771_v16, %v3741_v18  ;;  %v3724_v46 = vld [vmem:[%s7327_s3 + $0x48] sm:$0xff] }
 0x2aa   : > { %v3763_v22 = vmul.f32 %v5344_v41, %v3721_v43  ;;  %3792 = vst [vmem:[%s7166_s7 + $0x28] sm:$0xff] %v3780_v20  ;;  %3798 = vst [vmem:[%s7166_s7 + $0x58] sm:$0xff] %v3786_v58  ;;  %v5346_v3 = vpop.eup %5345  ;;  %v3736_v1 = vmul.f32 %v3730_v48, %v3724_v46 }
 0x2ab   : > { %v3675_v37 = vsub.f32 2.0, %v3672_v44  ;;  %3789 = vst [vmem:[%s7166_s7 + $0x10] sm:$0xff] %v3777_v59  ;;  %3795 = vst [vmem:[%s7166_s7 + $0x40] sm:$0xff] %v3783_v62  ;;  %v3764_v53 = vmul.f32 %v5346_v3, %v3722_v17  ;;  %v3718_v17 = vld [vmem:[%s7327_s3 + $0x18] sm:$0xff] }
 0x2ac   : > { %v3769_v34 = vmul.f32 0.5, %v3763_v22  ;;  %v3742_v51 = vadd.f32 %v3736_v1, %v3718_v17 }
 0x2ad   : > { %v3678_v30 = vmul.f32 %v5342_v11, %v3675_v37  ;;  %v5348_v45 = vpop.eup %5347 }
 0x2ae   : > { %v3775_v26 = vsub.f32 %v3739_v24, %v3769_v34  ;;  %v3781_v15 = vadd.f32 %v3769_v34, %v3739_v24  ;;  %v5350_v54 = vpop.eup %5349  ;;  %v3670_v25 = vmul.f32 %v5348_v45, %v7122_v19 }
 0x2af   : > { %v3681_v5 = vmul.f32 %v7043_v39, %v3678_v30  ;;  %v3684_v38 = vmul.f32 %v7045_v27, %v3678_v30  ;;  %v3687_v43 = vmul.f32 %v7052_v28, %v3678_v30  ;;  %v3690_v47 = vmul.f32 %v7054_v56, %v3678_v30  ;;  %v5352_v49 = vpop.eup %5351  ;;  %v3719_v39 = vld [vmem:[%s7327_s3 + $0x20] sm:$0xff] }
 0x2b0   : > { %v3693_v35 = vmul.f32 %v7060_v61, %v3678_v30  ;;  %v3696_v8 = vmul.f32 %v7073_v33, %v3678_v30  ;;  %3787 = vst [vmem:[%s7166_s7] sm:$0xff] %v3775_v26  ;;  %3793 = vst [vmem:[%s7166_s7 + $0x30] sm:$0xff] %v3781_v15  ;;  %v3770_v27 = vmul.f32 0.5, %v3764_v53  ;;  %v3766_v28 = vmul.f32 %v5350_v54, %v3724_v46 }
 0x2b1   : > { %3699 = vst [vmem:[%s7192_s15 + $0x10] sm:$0xff] %v3681_v5  ;;  %3702 = vst [vmem:[%s7192_s15 + $0x28] sm:$0xff] %v3684_v38  ;;  %v3767_v56 = vmul.f32 %v5352_v49, %v3725_v7  ;;  %v3673_v61 = vsub.f32 2.0, %v3670_v25  ;;  %v3743_v12 = vadd.f32 %v3737_v55, %v3719_v39 }
 0x2b2   : > { %3705 = vst [vmem:[%s7192_s15 + $0x40] sm:$0xff] %v3687_v43  ;;  %3708 = vst [vmem:[%s7192_s15 + $0x58] sm:$0xff] %v3690_v47  ;;  %v3776_v33 = vsub.f32 %v3740_v23, %v3770_v27  ;;  %v3782_v19 = vadd.f32 %v3770_v27, %v3740_v23  ;;  %v3772_v63 = vmul.f32 0.5, %v3766_v28 }
 0x2b3   : > { %3711 = vst [vmem:[%s7192_s15 + $0x70] sm:$0xff] %v3693_v35  ;;  %3714 = vst [vmem:[%s7192_s15 + $0x88] sm:$0xff] %v3696_v8  ;;  %v3773_v18 = vmul.f32 0.5, %v3767_v56  ;;  %v5354_v52 = vpop.eup %5353  ;;  %v3676_v10 = vmul.f32 %v5348_v45, %v3673_v61 }
 0x2b4   : > { %3788 = vst [vmem:[%s7166_s7 + $0x8] sm:$0xff] %v3776_v33  ;;  %3794 = vst [vmem:[%s7166_s7 + $0x38] sm:$0xff] %v3782_v19  ;;  %v3671_v11 = vmul.f32 %v5354_v52, %v7150_v31  ;;  %v3778_v16 = vsub.f32 %v3742_v51, %v3772_v63  ;;  %v3784_v9 = vadd.f32 %v3772_v63, %v3742_v51 }
 0x2b5   : > { %v3779_v48 = vsub.f32 %v3743_v12, %v3773_v18  ;;  %v3679_v41 = vmul.f32 %v7065_v57, %v3676_v10  ;;  %v3682_v44 = vmul.f32 %v7070_v2, %v3676_v10  ;;  %v3685_v20 = vmul.f32 %v7079_v42, %v3676_v10 }
 0x2b6   : > { %v3688_v58 = vmul.f32 %v7082_v29, %v3676_v10  ;;  %v3691_v31 = vmul.f32 %v7089_v0, %v3676_v10  ;;  %v3694_v32 = vmul.f32 %v7105_v14, %v3676_v10  ;;  %v3674_v60 = vsub.f32 2.0, %v3671_v11  ;;  %3790 = vst [vmem:[%s7166_s7 + $0x18] sm:$0xff] %v3778_v16  ;;  %3796 = vst [vmem:[%s7166_s7 + $0x48] sm:$0xff] %v3784_v9 }
 0x2b7   : > { %v3785_v57 = vadd.f32 %v3773_v18, %v3743_v12  ;;  %3791 = vst [vmem:[%s7166_s7 + $0x20] sm:$0xff] %v3779_v48  ;;  %3697 = vst [vmem:[%s7192_s15] sm:$0xff] %v3679_v41 }
 0x2b8   : > { %3700 = vst [vmem:[%s7192_s15 + $0x18] sm:$0xff] %v3682_v44  ;;  %3703 = vst [vmem:[%s7192_s15 + $0x30] sm:$0xff] %v3685_v20  ;;  %v3677_v2 = vmul.f32 %v5354_v52, %v3674_v60 }
 0x2b9   : > { %3706 = vst [vmem:[%s7192_s15 + $0x48] sm:$0xff] %v3688_v58  ;;  %3709 = vst [vmem:[%s7192_s15 + $0x60] sm:$0xff] %v3691_v31 }
 0x2ba   : > { %3712 = vst [vmem:[%s7192_s15 + $0x78] sm:$0xff] %v3694_v32  ;;  %3797 = vst [vmem:[%s7166_s7 + $0x50] sm:$0xff] %v3785_v57 }
 0x2bb   : > { %5372 = shalt.err (!%p5369_p3)
}
 0x2bc   : > { %s5373_s7 = scalar_lea.hbm %s7217_s25, 1536  ;;  %s5377_s17 = scalar_lea.hbm %s7329_s5, 3072 }
 0x2bd   : > { %p5374_p4 = scmp.ne.s32.totalorder %s7217_s25, %s5373_s7  ;;  %p5378_p9 = scmp.lt.u32.totalorder %s7217_s25, %s7329_s5 }
 0x2be   : > { %p5379_p10 = scmp.lt.u32.totalorder %s5377_s17, %s5373_s7  ;;  %p5381_p12 = scmp.lt.u32.totalorder %s5373_s7, %s7217_s25 }
 0x2bf   : > { %p5375_p7 = pnand %p5374_p4, %p5537_p5 }
 0x2c0   : > { %p5380_p11 = por %p5379_p10, %p5378_p9 }
 0x2c1   : > { %p5376_p8 = pneg %p5375_p7 }
 0x2c2   : > { %p5382_p13 = por %p5381_p12, %p5380_p11 }
 0x2c4   : > { %p5383_p0 = pnand %p5382_p13, %p5376_p8 }
 0x2c6   : > { %5386 = shalt.err (!%p5383_p0)
}
 0x2c7   : > { %s5466_s10 = smov 384   ;;  %s5467_s12 = smov 24   ;;  %v3680_v42 = vmul.f32 %v7093_v13, %v3677_v2  ;;  %v3683_v29 = vmul.f32 %v7098_v4, %v3677_v2  ;;  %v3686_v0 = vmul.f32 %v7114_v21, %v3677_v2  ;;  %v3689_v14 = vmul.f32 %v7119_v40, %v3677_v2 }
 0x2c8   : > { %4924 = dma.vmem_to_hbm [thread:$0]  (%p5537_p5), %s7219_s16, 1536, %s7217_s25, %s3805_s8, %s5466_s10, %s5466_s10, %s5467_s12   ;;  %v3692_v59 = vmul.f32 %v7125_v6, %v3677_v2  ;;  %v3695_v62 = vmul.f32 %v7147_v50, %v3677_v2 }
 0x2c9   : > { %s7268_s14 = scalar_lea.hbm %s7328_s4, %s4921_s26  ;;  %3698 = vst [vmem:[%s7192_s15 + $0x8] sm:$0xff] %v3680_v42  ;;  %3701 = vst [vmem:[%s7192_s15 + $0x20] sm:$0xff] %v3683_v29  ;;  %s3800_s16 = scalar_lea.sflag [#allocation3], %s7117_s30 }
 0x2ca   : > { %3704 = vst [vmem:[%s7192_s15 + $0x38] sm:$0xff] %v3686_v0  ;;  %3707 = vst [vmem:[%s7192_s15 + $0x50] sm:$0xff] %v3689_v14  ;;  %s5387_s25 = scalar_lea.vmem %s7272_s6, 2304  ;;  %s5468_s22 = smov [#allocation2]  }
 0x2cb   : > { %3710 = vst [vmem:[%s7192_s15 + $0x68] sm:$0xff] %v3692_v59  ;;  %3713 = vst [vmem:[%s7192_s15 + $0x80] sm:$0xff] %v3695_v62  ;;  %p5388_p1 = scmp.ne.s32.totalorder %s7272_s6, %s5387_s25  ;;  %s5391_s26 = sshll.u32 %s5468_s22, 4  ;;  %s5392_s26 = int_to_ptr.vmem [resolvable:$false] %s5391_s26 }
 0x2cc   : > { %s5393_s8 = scalar_lea.vmem %s5392_s26, 4608  ;;  %p5394_p4 = scmp.lt.s32.totalorder %s7272_s6, %s5392_s26 }
 0x2cd   : > { %p5389_p2 = pnand %p5388_p1, %p5537_p5  ;;  %p5395_p7 = scmp.lt.s32.totalorder %s5393_s8, %s5387_s25 }
 0x2cf   : > { %p5390_p3 = pneg %p5389_p2  ;;  %p5396_p8 = por %p5395_p7, %p5394_p4 }
 0x2d1   : > { %p5397_p9 = pnand %p5396_p8, %p5390_p3 }
 0x2d3   : > { %5400 = shalt.err (!%p5397_p9)
}
 0x2d4   : > { %s5401_s15 = scalar_lea.hbm %s7268_s14, 2304  ;;  %s5405_s23 = scalar_lea.hbm %s7328_s4, 4608 }
 0x2d5   : > { %p5402_p10 = scmp.ne.s32.totalorder %s7268_s14, %s5401_s15  ;;  %p5406_p13 = scmp.lt.u32.totalorder %s7268_s14, %s7328_s4 }
 0x2d6   : > { %p5407_p0 = scmp.lt.u32.totalorder %s5405_s23, %s5401_s15  ;;  %p5409_p2 = scmp.lt.u32.totalorder %s5401_s15, %s7268_s14 }
 0x2d7   : > { %p5403_p11 = pnand %p5402_p10, %p5537_p5 }
 0x2d8   : > { %p5408_p1 = por %p5407_p0, %p5406_p13 }
 0x2d9   : > { %p5404_p12 = pneg %p5403_p11 }
 0x2da   : > { %p5410_p3 = por %p5409_p2, %p5408_p1 }
 0x2dc   : > { %p5411_p4 = pnand %p5410_p3, %p5404_p12 }
 0x2de   : > { %5414 = shalt.err (!%p5411_p4)
}
 0x2df   : > { %4923 = dma.vmem_to_hbm [thread:$0]  (%p5537_p5), %s7272_s6, 2304, %s7268_s14, %s3800_s16, %s5466_s10, %s5466_s10, %s5467_s12  }
 0x2e0 PF: > { %p4934_p7 = scmp.ge.s32.totalorder %s5453_s21, 2  ;;  %s3849_s7 = sand.u32 1, %s5441_s18  }
 0x2e1   : > { %s3850_s25 = scalar_lea.sflag [#allocation3], %s3849_s7 }
 0x2e2   : > { %p4928_p8 = pnand %p4934_p7, %p5541_p6 }
 0x2e4   : > { %5432 = dma.done.wait (!%p4928_p8), %s3850_s25, 2304  }
 0x2e5   : > { %5434 = vsyncadd (!%p4928_p8), %s3850_s25, 4294964992  ;;  %s3859_s28 = scalar_lea.sflag [#allocation5], %s3849_s7 }
 0x2e6   : > { %5436 = dma.done.wait (!%p4928_p8), %s3859_s28, 1536  }
 0x2e7   : > { %5438 = vsyncadd (!%p4928_p8), %s3859_s28, 4294965760  ;;  %p19_p5 = scmp.ge.s32.totalorder %s5524_s24, 4   ;;  %s7375_s18 = smov %s5445_s19 }
 0x2e8   : > { %s7376_s19 = smov %s5449_s20  ;;  %s7377_s20 = smov %s5535_s27 }
 0x2e9   : > { %s7378_s21 = smov %s5524_s24  ;;  %21 = sbr.rel (!%p19_p5) target bundleno = 5 (0x5), region = 96 }
 0x2f0   :  { %3864 = vsyncpa [#allocation3], 1 }
 0x2f1   :  { %3866 = vsyncpa [#allocation3 + $0x1], 1 }
 0x2f2   :  { %3867 = vsyncpa [#allocation5], 1 }
 0x2f3   :  { %3869 = vsyncpa [#allocation5 + $0x1], 1 }

</bundles_post_ra>
